<compile_context>
chip_gen: v5e
topology: v5e:2x2
jax: 0.10.0
libtpu: 0.0.40
codegen_flags: <defaults>
</compile_context>

<pallas_src>
import functools
import numpy as np
import jax
import jax.numpy as jnp
from jax.experimental import pallas as pl
from jax.experimental.pallas import tpu as pltpu


def get_earth_position_index(window_size):
    """NumPy port of the PyTorch helper (torch.meshgrid defaults to 'ij' indexing)."""
    win_pl, win_lat, win_lon = window_size
    coords_zi = np.arange(win_pl)
    coords_zj = -np.arange(win_pl) * win_pl
    coords_hi = np.arange(win_lat)
    coords_hj = -np.arange(win_lat) * win_lat
    coords_w = np.arange(win_lon)
    coords_1 = np.stack(np.meshgrid(coords_zi, coords_hi, coords_w, indexing="ij"))
    coords_2 = np.stack(np.meshgrid(coords_zj, coords_hj, coords_w, indexing="ij"))
    coords_flatten_1 = coords_1.reshape(3, -1)
    coords_flatten_2 = coords_2.reshape(3, -1)
    coords = coords_flatten_1[:, :, None] - coords_flatten_2[:, None, :]
    coords = np.ascontiguousarray(coords.transpose(1, 2, 0))
    coords[:, :, 2] += win_lon - 1
    coords[:, :, 1] *= 2 * win_lon - 1
    coords[:, :, 0] *= (2 * win_lon - 1) * win_lat * win_lat
    return coords.sum(-1)  # (N, N) int


def _gather_position_bias(bias_table, window_size, nW_, num_heads):
    """bias_table -> (num_heads, nW_, N, N), plain-JAX glue (pure gather)."""
    N = window_size[0] * window_size[1] * window_size[2]
    epi = jnp.asarray(get_earth_position_index(window_size).reshape(-1))
    bias = bias_table[epi]                                   # (N*N, nW_, H)
    bias = bias.reshape(N, N, nW_, num_heads)
    return jnp.transpose(bias, (3, 2, 0, 1))                 # (H, nW_, N, N)


def _vmem_caps():
    """(per-step footprint budget, scoped vmem_limit_bytes) from the chip's VMEM size."""
    try:
        cap = int(pltpu.get_tpu_info().vmem_capacity_bytes)  # 128 MiB v5e/v6e, 64 MiB v7x
    except Exception:
        cap = 64 * 1024 * 1024                               # conservative fallback
    return int(cap * 0.60), int(cap * 0.85)


def _pick_batch_chunk(B_, N, C, H, n_lon, has_mask, cd_size, out_size, budget, nW_,
                      max_bc=None):
    """Largest valid batch-chunk whose estimated per-step VMEM footprint fits budget."""

    def est(bc):
        R = bc * N
        b = 2 * R * C * cd_size                          # x tile (double buffered)
        b += 2 * R * C * out_size                        # out tile (double buffered)
        b += 2 * H * N * N * cd_size                     # resident bias tile
        if has_mask:
            b += 2 * min(bc, n_lon) * N * N * cd_size    # resident mask tile
        b += 2 * (4 * C * C * cd_size + 4 * C * 4)       # weights + biases
        b += R * 3 * C * cd_size                         # head-major qkv scratch
        b += R * 3 * C * (4 + cd_size)                   # f32 qkv + one cd downcast
        b += H * bc * N * N * (8 + cd_size)              # scores f32 + exp + probs(cd)
        b += R * C * (8 + cd_size)                       # ctx f32 + y f32 + ctx cd
        return b

    cands = []
    for d in range(1, B_ + 1):
        if B_ % d:
            continue
        if has_mask and (d % n_lon != 0 and n_lon % d != 0):
            continue                                     # chunk must tile the lon axis
        if max_bc is not None and d > max_bc:
            continue
        cands.append(d)
    fitting = [d for d in cands if est(d) <= budget]
    pool = fitting if fitting else cands[:1]             # fallback: SMALLEST valid chunk
    best = max(pool)
    # keep >= 2 total grid steps so v7x can shard them across its two TensorCores
    if nW_ * (B_ // best) < 2:
        two_step = [d for d in pool if B_ // d >= 2]
        if two_step:
            best = max(two_step)
    return best


def _attn_kernel(*refs, num_heads, mask_mode, n_lon, compute_dtype, exp_dtype,
                 approx_recip):
    # refs: x, wqkv, bqkv, bias, [mask], wp, bp, out, qkv_hm_scratch
    # mask_mode: 0 = no mask, 1 = mask block (nLon,N,N) broadcast over BC//nLon,
    #            2 = mask block (BC,N,N) selected by the grid index (BC < nLon).
    if mask_mode:
        (x_ref, wqkv_ref, bqkv_ref, bias_ref, mask_ref, wp_ref, bp_ref,
         o_ref, qkv_hm_ref) = refs
    else:
        (x_ref, wqkv_ref, bqkv_ref, bias_ref, wp_ref, bp_ref,
         o_ref, qkv_hm_ref) = refs
        mask_ref = None

    BC, N, C = x_ref.shape            # batch-chunk, tokens per window, channels
    H = num_heads
    hd = C // H
    R = BC * N
    cd = compute_dtype

    # ---- fused QKV projection over all BC*N rows (scale + head-major column order
    #      already folded into Wqkv / bqkv); downcast to compute dtype ONCE.
    x = x_ref[...].reshape(R, C)
    qkv = jnp.dot(x, wqkv_ref[...], preferred_element_type=jnp.float32) + bqkv_ref[...]
    qkv = qkv.astype(cd)                                           # (R, 3C)

    # ---- single head-major relayout: per head ONE contiguous lane slice -> scratch.
    for h in range(H):
        qkv_hm_ref[h] = qkv[:, h * 3 * hd:(h + 1) * 3 * hd].reshape(BC, N, 3 * hd)

    qkv_hm = qkv_hm_ref[...].reshape(H * BC, N, 3 * hd)
    q = qkv_hm[..., :hd]
    k = qkv_hm[..., hd:2 * hd]
    v = qkv_hm[..., 2 * hd:]

    # ---- batched attention over all (head, window) pairs: one call per matmul,
    #      one bias add, one mask add, one softmax.
    s = jnp.einsum("bnd,bmd->bnm", q, k,
                   preferred_element_type=jnp.float32)             # (H*BC, N, N) f32
    s = s.reshape(H, BC, N, N) + bias_ref[...][:, None]            # bias (H, N, N)
    if mask_mode == 1:
        mask = jnp.broadcast_to(mask_ref[...][None],
                                (BC // n_lon, n_lon, N, N)).reshape(BC, N, N)
        s = s + mask[None]
    elif mask_mode == 2:
        s = s + mask_ref[...][None]
    s = s.reshape(H * BC, N, N)

    m = jnp.max(s, axis=-1, keepdims=True)
    e = jnp.exp((s - m).astype(exp_dtype))                         # bf16 exp on fast path
    l = jnp.sum(e.astype(jnp.float32), axis=-1, keepdims=True)     # f32 denominator
    # attn_drop / proj_drop are identity (p=0.0, eval mode)
    ctx = jnp.einsum("bnm,bmd->bnd", e.astype(cd), v,
                     preferred_element_type=jnp.float32)           # (H*BC, N, hd) f32
    # normalize AFTER the PV matmul (exact; ~N/hd fewer multiplies than scaling probs)
    ctx = (ctx * pl.reciprocal(l, approx=approx_recip)).astype(cd)

    # ---- heads back onto lanes (one concat), then ONE fused output projection.
    ctx = ctx.reshape(H, R, hd)
    ctx_all = jnp.concatenate([ctx[h] for h in range(H)], axis=-1)  # (R, C)
    y = jnp.dot(ctx_all, wp_ref[...], preferred_element_type=jnp.float32) + bp_ref[...]
    o_ref[...] = y.reshape(BC, N, C).astype(o_ref.dtype)


def earth_attention_3d(x, params, window_size, input_resolution, num_heads,
                       mask=None, compute_dtype=jnp.bfloat16, out_dtype=None,
                       approx_recip=True, bf16_exp=True, max_batch_chunk=None):
    B_, nW_, N, C = x.shape
    H = num_heads
    assert C % H == 0
    hd = C // H
    scale = hd ** (-0.5)
    type_of_windows = (input_resolution[0] // window_size[0]) * \
                      (input_resolution[1] // window_size[1])
    assert nW_ == type_of_windows
    assert N == window_size[0] * window_size[1] * window_size[2]
    cd = jnp.dtype(compute_dtype)
    out_dtype = x.dtype if out_dtype is None else jnp.dtype(out_dtype)
    # bf16 exp only pays off on chips with a bf16 EUP (v6e/v7x); pass bf16_exp=False on v5e.
    exp_dtype = cd if (bf16_exp and cd == jnp.dtype(jnp.bfloat16)) else jnp.dtype(jnp.float32)

    # ---- one-time parameter prep (plain JAX) ----
    # Fold the qk scale into the Q columns, then permute the output columns to the
    # head-major order [h][q|k|v][d] so the in-kernel relayout is one slice per head.
    col_scale = np.concatenate([np.full(C, scale, np.float32),
                                np.ones(2 * C, np.float32)])
    perm = np.concatenate([np.arange(hd) + t * C + h * hd
                           for h in range(H) for t in range(3)])
    wqkv = (params["wqkv"].astype(jnp.float32) * col_scale[None, :])[:, perm].astype(cd)
    bqkv = (params["bqkv"].astype(jnp.float32) * col_scale)[perm].reshape(1, 3 * C)
    wp = params["wp"].astype(cd)
    bp = params["bp"].astype(jnp.float32).reshape(1, C)
    bias = _gather_position_bias(params["bias_table"], window_size,
                                 nW_, H).astype(cd)                 # (H, nW_, N, N)
    x_c = x.astype(cd)

    if mask is not None:
        nLon = mask.shape[0]
        # B_ is laid out (batch, lon) with the longitude index fastest, exactly as in
        # the PyTorch reference's view(B_ // nLon, nLon, ...).
        assert B_ % nLon == 0
        assert mask.shape == (nLon, nW_, N, N)
        mask_arr = mask.astype(cd)
    else:
        nLon = 1
        mask_arr = None

    budget, vmem_limit = _vmem_caps()
    BC = _pick_batch_chunk(B_, N, C, H, nLon, mask is not None,
                           cd.itemsize, out_dtype.itemsize, budget, nW_,
                           max_bc=max_batch_chunk)

    if mask is None:
        mask_mode = 0
    elif BC % nLon == 0:
        mask_mode = 1
    else:
        assert nLon % BC == 0
        mask_mode = 2

    kernel = functools.partial(_attn_kernel, num_heads=H, mask_mode=mask_mode,
                               n_lon=nLon, compute_dtype=cd, exp_dtype=exp_dtype,
                               approx_recip=approx_recip)

    in_specs = [
        pl.BlockSpec((BC, None, N, C), lambda w, c: (c, w, 0, 0)),          # x
        pl.BlockSpec((C, 3 * C), lambda w, c: (0, 0)),                      # Wqkv (resident)
        pl.BlockSpec((1, 3 * C), lambda w, c: (0, 0)),                      # bqkv (resident)
        pl.BlockSpec((H, None, N, N), lambda w, c: (0, w, 0, 0)),           # bias (resident per w)
    ]
    inputs = [x_c, wqkv, bqkv, bias]
    if mask_mode == 1:
        in_specs.append(pl.BlockSpec((nLon, None, N, N), lambda w, c: (0, w, 0, 0)))
        inputs.append(mask_arr)
    elif mask_mode == 2:
        n_blk = nLon // BC
        in_specs.append(pl.BlockSpec((BC, None, N, N),
                                     lambda w, c: (c % n_blk, w, 0, 0)))
        inputs.append(mask_arr)
    in_specs += [
        pl.BlockSpec((C, C), lambda w, c: (0, 0)),                          # Wproj (resident)
        pl.BlockSpec((1, C), lambda w, c: (0, 0)),                          # bproj (resident)
    ]
    inputs += [wp, bp]

    out = pl.pallas_call(
        kernel,
        out_shape=jax.ShapeDtypeStruct((B_, nW_, N, C), out_dtype),
        grid_spec=pltpu.PrefetchScalarGridSpec(
            num_scalar_prefetch=0,
            grid=(nW_, B_ // BC),                # batch-chunk innermost -> bias stays resident
            in_specs=in_specs,
            out_specs=pl.BlockSpec((BC, None, N, C), lambda w, c: (c, w, 0, 0)),
            scratch_shapes=[pltpu.VMEM((H, BC, N, 3 * hd), cd)],            # head-major qkv
        ),
        compiler_params=pltpu.CompilerParams(
            dimension_semantics=("parallel", "parallel"),    # no cross-step accumulator
            vmem_limit_bytes=vmem_limit),
    )(*inputs)
    return out


def reference_forward(x, params, window_size, num_heads, mask=None):
    """Pure-JAX f32 reference mirroring the PyTorch forward exactly."""
    B_, nW_, N, C = x.shape
    hd = C // num_heads
    scale = hd ** (-0.5)
    qkv = x @ params["wqkv"] + params["bqkv"]
    qkv = qkv.reshape(B_, nW_, N, 3, num_heads, hd).transpose(3, 0, 4, 1, 2, 5)
    q, k, v = qkv[0], qkv[1], qkv[2]
    q = q * scale
    attn = jnp.einsum("bhwnd,bhwmd->bhwnm", q, k)
    bias = _gather_position_bias(params["bias_table"], window_size, nW_, num_heads)
    attn = attn + bias[None]
    if mask is not None:
        nLon = mask.shape[0]
        attn = attn.reshape(B_ // nLon, nLon, num_heads, nW_, N, N) + mask[None, :, None]
        attn = attn.reshape(B_, num_heads, nW_, N, N)
    attn = jax.nn.softmax(attn, axis=-1)
    out = jnp.einsum("bhwnm,bhwmd->bhwnd", attn, v)
    out = out.transpose(0, 2, 3, 1, 4).reshape(B_, nW_, N, C)
    return out @ params["wp"] + params["bp"]


if __name__ == "__main__":
    key = jax.random.PRNGKey(0)
    dim = 32
    num_heads = 4
    window_size = (2, 4, 2)          # (Wpl, Wlat, Wlon) -> N = 16
    input_resolution = (4, 8, 4)     # type_of_windows = 2*2 = 4, num_lon = 2
    N = window_size[0] * window_size[1] * window_size[2]
    type_of_windows = (input_resolution[0] // window_size[0]) * \
                      (input_resolution[1] // window_size[1])
    num_lon = input_resolution[2] // window_size[2]
    B = 2
    B_ = B * num_lon

    ks = jax.random.split(key, 8)
    table_len = window_size[0] ** 2 * window_size[1] ** 2 * (window_size[2] * 2 - 1)
    params = {
        # trunc_normal_(std=0.02) surrogate: deterministic normal * 0.02
        "bias_table": 0.02 * jax.random.normal(
            ks[0], (table_len, type_of_windows, num_heads), jnp.float32),
        "wqkv": 0.05 * jax.random.normal(ks[1], (dim, 3 * dim), jnp.float32),
        "bqkv": 0.05 * jax.random.normal(ks[2], (3 * dim,), jnp.float32),
        "wp":   0.05 * jax.random.normal(ks[3], (dim, dim), jnp.float32),
        "bp":   0.05 * jax.random.normal(ks[4], (dim,), jnp.float32),
    }
    x = jax.random.normal(ks[5], (B_, type_of_windows, N, dim), jnp.float32)
    mask = jnp.where(
        jax.random.uniform(ks[6], (num_lon, type_of_windows, N, N)) > 0.3,
        0.0, -100.0).astype(jnp.float32)

    ref_m = reference_forward(x, params, window_size, num_heads, mask=mask)
    ref_u = reference_forward(x, params, window_size, num_heads, mask=None)

    # --- f32 compute path (approx reciprocal only), masked + unmasked ---
    out = jax.block_until_ready(
        earth_attention_3d(x, params, window_size, input_resolution, num_heads,
                           mask=mask, compute_dtype=jnp.float32))
    assert jnp.allclose(out, ref_m, atol=1e-3, rtol=1e-3), \
        float(jnp.max(jnp.abs(out - ref_m)))

    out2 = jax.block_until_ready(
        earth_attention_3d(x, params, window_size, input_resolution, num_heads,
                           mask=None, compute_dtype=jnp.float32))
    assert jnp.allclose(out2, ref_u, atol=1e-3, rtol=1e-3), \
        float(jnp.max(jnp.abs(out2 - ref_u)))

    # --- f32 path with a tiny batch-chunk to exercise the BC < nLon mask mode ---
    out3 = jax.block_until_ready(
        earth_attention_3d(x, params, window_size, input_resolution, num_heads,
                           mask=mask, compute_dtype=jnp.float32, max_batch_chunk=1))
    assert jnp.allclose(out3, ref_m, atol=1e-3, rtol=1e-3), \
        float(jnp.max(jnp.abs(out3 - ref_m)))

    # --- fast path: bf16 MXU operands + bf16 exp, f32 accumulation (looser tolerance) ---
    out4 = jax.block_until_ready(
        earth_attention_3d(x, params, window_size, input_resolution, num_heads,
                           mask=mask, compute_dtype=jnp.bfloat16))
    assert jnp.allclose(out4, ref_m, atol=5e-2, rtol=5e-2), \
        float(jnp.max(jnp.abs(out4 - ref_m)))

    print("KERNEL_OK")
</pallas_src>

<mosaic_0001>
module attributes {stable_mosaic.version = 11 : i64} {
  func.func @_attn_kernel(%arg0: i32, %arg1: i32, %arg2: memref<4x1x16x32xf32, #tpu.memory_space<vmem>>, %arg3: memref<32x96xf32, #tpu.memory_space<vmem>>, %arg4: memref<1x96xf32, #tpu.memory_space<vmem>>, %arg5: memref<4x1x16x16xf32, #tpu.memory_space<vmem>>, %arg6: memref<2x1x16x16xf32, #tpu.memory_space<vmem>>, %arg7: memref<32x32xf32, #tpu.memory_space<vmem>>, %arg8: memref<1x32xf32, #tpu.memory_space<vmem>>, %arg9: memref<4x1x16x32xf32, #tpu.memory_space<vmem>>, %arg10: memref<4x4x16x24xf32, #tpu.memory_space<vmem>>) attributes {dimension_semantics = [#tpu.dimension_semantics<parallel>, #tpu.dimension_semantics<parallel>], iteration_bounds = array<i64: 4, 1>, scalar_prefetch = 0 : i64, scratch_operands = 1 : i64, tpu.core_type = #tpu.core_type<tc>, window_params = [{transform_indices = @transform_0, window_bounds = array<i64: 4, 1, 16, 32>}, {pipeline_mode = #tpu.pipeline_mode<synchronous>, transform_indices = @transform_1, window_bounds = array<i64: 32, 96>}, {pipeline_mode = #tpu.pipeline_mode<synchronous>, transform_indices = @transform_2, window_bounds = array<i64: 1, 96>}, {transform_indices = @transform_3, window_bounds = array<i64: 4, 1, 16, 16>}, {transform_indices = @transform_4, window_bounds = array<i64: 2, 1, 16, 16>}, {pipeline_mode = #tpu.pipeline_mode<synchronous>, transform_indices = @transform_5, window_bounds = array<i64: 32, 32>}, {pipeline_mode = #tpu.pipeline_mode<synchronous>, transform_indices = @transform_6, window_bounds = array<i64: 1, 32>}, {transform_indices = @transform_7, window_bounds = array<i64: 4, 1, 16, 32>}]} {
    %c0 = arith.constant 0 : index
    %c0_0 = arith.constant 0 : index
    %c0_1 = arith.constant 0 : index
    %c0_2 = arith.constant 0 : index
    %0 = vector.load %arg2[%c0, %c0_0, %c0_1, %c0_2] : memref<4x1x16x32xf32, #tpu.memory_space<vmem>>, vector<4x1x16x32xf32>
    %1 = vector.shape_cast %0 : vector<4x1x16x32xf32> to vector<4x16x32xf32>
    %2 = vector.shape_cast %1 : vector<4x16x32xf32> to vector<64x32xf32>
    %c0_3 = arith.constant 0 : index
    %c0_4 = arith.constant 0 : index
    %3 = vector.load %arg3[%c0_3, %c0_4] : memref<32x96xf32, #tpu.memory_space<vmem>>, vector<32x96xf32>
    %cst = arith.constant dense<0.000000e+00> : vector<64x96xf32>
    %4 = tpu.matmul %2, %3, %cst {dimension_numbers = #tpu.dot_dimension_numbers<[1], [0], [0], [1], [0, 0, 1, 1], [], []>} : vector<64x32xf32>, vector<32x96xf32>, vector<64x96xf32> -> vector<64x96xf32>
    %c0_5 = arith.constant 0 : index
    %c0_6 = arith.constant 0 : index
    %5 = vector.load %arg4[%c0_5, %c0_6] : memref<1x96xf32, #tpu.memory_space<vmem>>, vector<1x96xf32>
    %6 = vector.broadcast %5 : vector<1x96xf32> to vector<64x96xf32>
    %7 = arith.addf %4, %6 : vector<64x96xf32>
    %8 = vector.extract_strided_slice %7 {offsets = [0, 0], sizes = [64, 24], strides = [1, 1]} : vector<64x96xf32> to vector<64x24xf32>
    %9 = vector.shape_cast %8 : vector<64x24xf32> to vector<4x16x24xf32>
    %c0_7 = arith.constant 0 : index
    %c0_8 = arith.constant 0 : index
    %c0_9 = arith.constant 0 : index
    %c0_10 = arith.constant 0 : index
    %10 = vector.load %arg10[%c0_7, %c0_8, %c0_9, %c0_10] : memref<4x4x16x24xf32, #tpu.memory_space<vmem>>, vector<1x4x16x24xf32>
    %11 = vector.shape_cast %10 : vector<1x4x16x24xf32> to vector<4x16x24xf32>
    %12 = vector.shape_cast %9 : vector<4x16x24xf32> to vector<1x4x16x24xf32>
    tpu.vector_store %arg10[%c0_7, %c0_8, %c0_9, %c0_10], %12 {strides = array<i32>} : memref<4x4x16x24xf32, #tpu.memory_space<vmem>>, vector<1x4x16x24xf32>,
    %13 = vector.extract_strided_slice %7 {offsets = [0, 24], sizes = [64, 24], strides = [1, 1]} : vector<64x96xf32> to vector<64x24xf32>
    %14 = vector.shape_cast %13 : vector<64x24xf32> to vector<4x16x24xf32>
    %c1 = arith.constant 1 : index
    %c0_11 = arith.constant 0 : index
    %c0_12 = arith.constant 0 : index
    %c0_13 = arith.constant 0 : index
    %15 = vector.load %arg10[%c1, %c0_11, %c0_12, %c0_13] : memref<4x4x16x24xf32, #tpu.memory_space<vmem>>, vector<1x4x16x24xf32>
    %16 = vector.shape_cast %15 : vector<1x4x16x24xf32> to vector<4x16x24xf32>
    %17 = vector.shape_cast %14 : vector<4x16x24xf32> to vector<1x4x16x24xf32>
    tpu.vector_store %arg10[%c1, %c0_11, %c0_12, %c0_13], %17 {strides = array<i32>} : memref<4x4x16x24xf32, #tpu.memory_space<vmem>>, vector<1x4x16x24xf32>,
    %18 = vector.extract_strided_slice %7 {offsets = [0, 48], sizes = [64, 24], strides = [1, 1]} : vector<64x96xf32> to vector<64x24xf32>
    %19 = vector.shape_cast %18 : vector<64x24xf32> to vector<4x16x24xf32>
    %c2 = arith.constant 2 : index
    %c0_14 = arith.constant 0 : index
    %c0_15 = arith.constant 0 : index
    %c0_16 = arith.constant 0 : index
    %20 = vector.load %arg10[%c2, %c0_14, %c0_15, %c0_16] : memref<4x4x16x24xf32, #tpu.memory_space<vmem>>, vector<1x4x16x24xf32>
    %21 = vector.shape_cast %20 : vector<1x4x16x24xf32> to vector<4x16x24xf32>
    %22 = vector.shape_cast %19 : vector<4x16x24xf32> to vector<1x4x16x24xf32>
    tpu.vector_store %arg10[%c2, %c0_14, %c0_15, %c0_16], %22 {strides = array<i32>} : memref<4x4x16x24xf32, #tpu.memory_space<vmem>>, vector<1x4x16x24xf32>,
    %23 = vector.extract_strided_slice %7 {offsets = [0, 72], sizes = [64, 24], strides = [1, 1]} : vector<64x96xf32> to vector<64x24xf32>
    %24 = vector.shape_cast %23 : vector<64x24xf32> to vector<4x16x24xf32>
    %c3 = arith.constant 3 : index
    %c0_17 = arith.constant 0 : index
    %c0_18 = arith.constant 0 : index
    %c0_19 = arith.constant 0 : index
    %25 = vector.load %arg10[%c3, %c0_17, %c0_18, %c0_19] : memref<4x4x16x24xf32, #tpu.memory_space<vmem>>, vector<1x4x16x24xf32>
    %26 = vector.shape_cast %25 : vector<1x4x16x24xf32> to vector<4x16x24xf32>
    %27 = vector.shape_cast %24 : vector<4x16x24xf32> to vector<1x4x16x24xf32>
    tpu.vector_store %arg10[%c3, %c0_17, %c0_18, %c0_19], %27 {strides = array<i32>} : memref<4x4x16x24xf32, #tpu.memory_space<vmem>>, vector<1x4x16x24xf32>,
    %c0_20 = arith.constant 0 : index
    %c0_21 = arith.constant 0 : index
    %c0_22 = arith.constant 0 : index
    %c0_23 = arith.constant 0 : index
    %28 = vector.load %arg10[%c0_20, %c0_21, %c0_22, %c0_23] : memref<4x4x16x24xf32, #tpu.memory_space<vmem>>, vector<4x4x16x24xf32>
    %29 = vector.shape_cast %28 : vector<4x4x16x24xf32> to vector<16x16x24xf32>
    %30 = vector.extract_strided_slice %29 {offsets = [0, 0, 0], sizes = [16, 16, 8], strides = [1, 1, 1]} : vector<16x16x24xf32> to vector<16x16x8xf32>
    %31 = vector.extract_strided_slice %29 {offsets = [0, 0, 8], sizes = [16, 16, 8], strides = [1, 1, 1]} : vector<16x16x24xf32> to vector<16x16x8xf32>
    %32 = vector.extract_strided_slice %29 {offsets = [0, 0, 16], sizes = [16, 16, 8], strides = [1, 1, 1]} : vector<16x16x24xf32> to vector<16x16x8xf32>
    "tpu.trace_start"() <{level = 10 : i32, message = "bnd,bmd->bnm"}> : () -> ()
    %cst_24 = arith.constant dense<0.000000e+00> : vector<16x16x16xf32>
    %33 = tpu.matmul %30, %31, %cst_24 {dimension_numbers = #tpu.dot_dimension_numbers<[2], [2], [1], [1], [0, 0, 0, 1, 1, 1], [0], [0]>} : vector<16x16x8xf32>, vector<16x16x8xf32>, vector<16x16x16xf32> -> vector<16x16x16xf32>
    "tpu.trace_stop"() : () -> ()
    %34 = vector.shape_cast %33 : vector<16x16x16xf32> to vector<4x4x16x16xf32>
    %c0_25 = arith.constant 0 : index
    %c0_26 = arith.constant 0 : index
    %c0_27 = arith.constant 0 : index
    %c0_28 = arith.constant 0 : index
    %35 = vector.load %arg5[%c0_25, %c0_26, %c0_27, %c0_28] : memref<4x1x16x16xf32, #tpu.memory_space<vmem>>, vector<4x1x16x16xf32>
    %36 = vector.shape_cast %35 : vector<4x1x16x16xf32> to vector<4x16x16xf32>
    %37 = vector.shape_cast %36 : vector<4x16x16xf32> to vector<4x1x16x16xf32>
    %38 = vector.broadcast %37 : vector<4x1x16x16xf32> to vector<4x4x16x16xf32>
    %39 = arith.addf %34, %38 : vector<4x4x16x16xf32>
    %c0_29 = arith.constant 0 : index
    %c0_30 = arith.constant 0 : index
    %c0_31 = arith.constant 0 : index
    %c0_32 = arith.constant 0 : index
    %40 = vector.load %arg6[%c0_29, %c0_30, %c0_31, %c0_32] : memref<2x1x16x16xf32, #tpu.memory_space<vmem>>, vector<2x1x16x16xf32>
    %41 = vector.shape_cast %40 : vector<2x1x16x16xf32> to vector<2x16x16xf32>
    %42 = vector.shape_cast %41 : vector<2x16x16xf32> to vector<1x2x16x16xf32>
    %43 = vector.shape_cast %42 : vector<1x2x16x16xf32> to vector<1x2x16x16xf32>
    %44 = vector.broadcast %43 : vector<1x2x16x16xf32> to vector<2x2x16x16xf32>
    %45 = vector.shape_cast %44 : vector<2x2x16x16xf32> to vector<4x16x16xf32>
    %46 = vector.shape_cast %45 : vector<4x16x16xf32> to vector<1x4x16x16xf32>
    %47 = vector.broadcast %46 : vector<1x4x16x16xf32> to vector<4x4x16x16xf32>
    %48 = arith.addf %39, %47 : vector<4x4x16x16xf32>
    %49 = vector.shape_cast %48 : vector<4x4x16x16xf32> to vector<16x16x16xf32>
    %cst_33 = arith.constant dense<0xFF800000> : vector<16x16xf32>
    %50 = vector.multi_reduction <maximumf>, %49, %cst_33 [2] : vector<16x16x16xf32> to vector<16x16xf32>
    %51 = vector.shape_cast %50 : vector<16x16xf32> to vector<16x16x1xf32>
    %52 = vector.broadcast %51 : vector<16x16x1xf32> to vector<16x16x16xf32>
    %53 = arith.subf %49, %52 : vector<16x16x16xf32>
    %54 = math.exp %53 : vector<16x16x16xf32>
    %cst_34 = arith.constant dense<0.000000e+00> : vector<16x16xf32>
    %55 = vector.multi_reduction <add>, %54, %cst_34 [2] : vector<16x16x16xf32> to vector<16x16xf32>
    %56 = vector.shape_cast %55 : vector<16x16xf32> to vector<16x16x1xf32>
    "tpu.trace_start"() <{level = 10 : i32, message = "bnm,bmd->bnd"}> : () -> ()
    %cst_35 = arith.constant dense<0.000000e+00> : vector<16x16x8xf32>
    %57 = tpu.matmul %54, %32, %cst_35 {dimension_numbers = #tpu.dot_dimension_numbers<[2], [1], [1], [2], [0, 0, 0, 1, 1, 2], [0], [0]>} : vector<16x16x16xf32>, vector<16x16x8xf32>, vector<16x16x8xf32> -> vector<16x16x8xf32>
    "tpu.trace_stop"() : () -> ()
    %58 = tpu.reciprocal %56 {approx = true} : vector<16x16x1xf32> -> vector<16x16x1xf32>
    %59 = vector.broadcast %58 : vector<16x16x1xf32> to vector<16x16x8xf32>
    %60 = arith.mulf %57, %59 : vector<16x16x8xf32>
    %61 = vector.shape_cast %60 : vector<16x16x8xf32> to vector<4x64x8xf32>
    %62 = vector.extract_strided_slice %61 {offsets = [0, 0, 0], sizes = [1, 64, 8], strides = [1, 1, 1]} : vector<4x64x8xf32> to vector<1x64x8xf32>
    %63 = vector.shape_cast %62 : vector<1x64x8xf32> to vector<64x8xf32>
    %64 = vector.extract_strided_slice %61 {offsets = [1, 0, 0], sizes = [1, 64, 8], strides = [1, 1, 1]} : vector<4x64x8xf32> to vector<1x64x8xf32>
    %65 = vector.shape_cast %64 : vector<1x64x8xf32> to vector<64x8xf32>
    %66 = vector.extract_strided_slice %61 {offsets = [2, 0, 0], sizes = [1, 64, 8], strides = [1, 1, 1]} : vector<4x64x8xf32> to vector<1x64x8xf32>
    %67 = vector.shape_cast %66 : vector<1x64x8xf32> to vector<64x8xf32>
    %68 = vector.extract_strided_slice %61 {offsets = [3, 0, 0], sizes = [1, 64, 8], strides = [1, 1, 1]} : vector<4x64x8xf32> to vector<1x64x8xf32>
    %69 = vector.shape_cast %68 : vector<1x64x8xf32> to vector<64x8xf32>
    %70 = tpu.concatenate %63, %65, %67, %69 in 1 : vector<64x8xf32>, vector<64x8xf32>, vector<64x8xf32>, vector<64x8xf32> -> vector<64x32xf32>
    %c0_36 = arith.constant 0 : index
    %c0_37 = arith.constant 0 : index
    %71 = vector.load %arg7[%c0_36, %c0_37] : memref<32x32xf32, #tpu.memory_space<vmem>>, vector<32x32xf32>
    %cst_38 = arith.constant dense<0.000000e+00> : vector<64x32xf32>
    %72 = tpu.matmul %70, %71, %cst_38 {dimension_numbers = #tpu.dot_dimension_numbers<[1], [0], [0], [1], [0, 0, 1, 1], [], []>} : vector<64x32xf32>, vector<32x32xf32>, vector<64x32xf32> -> vector<64x32xf32>
    %c0_39 = arith.constant 0 : index
    %c0_40 = arith.constant 0 : index
    %73 = vector.load %arg8[%c0_39, %c0_40] : memref<1x32xf32, #tpu.memory_space<vmem>>, vector<1x32xf32>
    %74 = vector.broadcast %73 : vector<1x32xf32> to vector<64x32xf32>
    %75 = arith.addf %72, %74 : vector<64x32xf32>
    %76 = vector.shape_cast %75 : vector<64x32xf32> to vector<4x16x32xf32>
    %c0_41 = arith.constant 0 : index
    %c0_42 = arith.constant 0 : index
    %c0_43 = arith.constant 0 : index
    %c0_44 = arith.constant 0 : index
    %77 = vector.load %arg9[%c0_41, %c0_42, %c0_43, %c0_44] : memref<4x1x16x32xf32, #tpu.memory_space<vmem>>, vector<4x1x16x32xf32>
    %78 = vector.shape_cast %77 : vector<4x1x16x32xf32> to vector<4x16x32xf32>
    %79 = vector.shape_cast %76 : vector<4x16x32xf32> to vector<4x1x16x32xf32>
    tpu.vector_store %arg9[%c0_41, %c0_42, %c0_43, %c0_44], %79 {strides = array<i32>} : memref<4x1x16x32xf32, #tpu.memory_space<vmem>>, vector<4x1x16x32xf32>,
    return
  }
  func.func @transform_0(%arg0: i32, %arg1: i32) -> (i32, i32, i32, i32) {
    %c0_i32 = arith.constant 0 : i32
    %c0_i32_0 = arith.constant 0 : i32
    %c0_i32_1 = arith.constant 0 : i32
    return %arg1, %arg0, %c0_i32, %c0_i32_0 : i32, i32, i32, i32
  }
  func.func @transform_1(%arg0: i32, %arg1: i32) -> (i32, i32) {
    %c0_i32 = arith.constant 0 : i32
    %c0_i32_0 = arith.constant 0 : i32
    %c0_i32_1 = arith.constant 0 : i32
    return %c0_i32, %c0_i32_0 : i32, i32
  }
  func.func @transform_2(%arg0: i32, %arg1: i32) -> (i32, i32) {
    %c0_i32 = arith.constant 0 : i32
    %c0_i32_0 = arith.constant 0 : i32
    %c0_i32_1 = arith.constant 0 : i32
    return %c0_i32, %c0_i32_0 : i32, i32
  }
  func.func @transform_3(%arg0: i32, %arg1: i32) -> (i32, i32, i32, i32) {
    %c0_i32 = arith.constant 0 : i32
    %c0_i32_0 = arith.constant 0 : i32
    %c0_i32_1 = arith.constant 0 : i32
    %c0_i32_2 = arith.constant 0 : i32
    return %c0_i32, %arg0, %c0_i32_0, %c0_i32_1 : i32, i32, i32, i32
  }
  func.func @transform_4(%arg0: i32, %arg1: i32) -> (i32, i32, i32, i32) {
    %c0_i32 = arith.constant 0 : i32
    %c0_i32_0 = arith.constant 0 : i32
    %c0_i32_1 = arith.constant 0 : i32
    %c0_i32_2 = arith.constant 0 : i32
    return %c0_i32, %arg0, %c0_i32_0, %c0_i32_1 : i32, i32, i32, i32
  }
  func.func @transform_5(%arg0: i32, %arg1: i32) -> (i32, i32) {
    %c0_i32 = arith.constant 0 : i32
    %c0_i32_0 = arith.constant 0 : i32
    %c0_i32_1 = arith.constant 0 : i32
    return %c0_i32, %c0_i32_0 : i32, i32
  }
  func.func @transform_6(%arg0: i32, %arg1: i32) -> (i32, i32) {
    %c0_i32 = arith.constant 0 : i32
    %c0_i32_0 = arith.constant 0 : i32
    %c0_i32_1 = arith.constant 0 : i32
    return %c0_i32, %c0_i32_0 : i32, i32
  }
  func.func @transform_7(%arg0: i32, %arg1: i32) -> (i32, i32, i32, i32) {
    %c0_i32 = arith.constant 0 : i32
    %c0_i32_0 = arith.constant 0 : i32
    %c0_i32_1 = arith.constant 0 : i32
    return %arg1, %arg0, %c0_i32, %c0_i32_0 : i32, i32, i32, i32
  }
}

</mosaic_0001>

<bundles_post_ra>
// kernel: tpu_custom_call.1
= control target key start
LH: loop header
LB: loop body
LE: loop exit
PB: predicated region body
PF: predicated region fallthrough
CT: control target
= control target key end

     0   :  { %s4543_s0 = inlined_call_operand.hbm [shape: f32[4,4,16,32], index: 0, kind: input, shape index: {}]   ;;  %s4544_s1 = inlined_call_operand.hbm [shape: f32[32,96], index: 1, kind: input, shape index: {}]   ;;  %s4545_s2 = inlined_call_operand.vmem [shape: f32[1,96], index: 2, kind: input, shape index: {}]   ;;  %s4546_s3 = inlined_call_operand.hbm [shape: f32[4,4,16,16], index: 3, kind: input, shape index: {}]   ;;  %s4547_s4 = inlined_call_operand.hbm [shape: f32[2,4,16,16], index: 4, kind: input, shape index: {}]   ;;  %s4548_s5 = inlined_call_operand.hbm [shape: f32[32,32], index: 5, kind: input, shape index: {}]   ;;  %s4549_s6 = inlined_call_operand.vmem [shape: f32[1,32], index: 6, kind: input, shape index: {}]   ;;  %s4550_s7 = inlined_call_operand.hbm [shape: f32[4,4,16,32], index: 7, kind: output, shape index: {}]  }
   0x1   :  { %4554 = sst [smem:[#allocation31_spill]] %s4543_s0 }
   0x2   :  { %4555 = sst [smem:[#allocation32_spill]] %s4544_s1 }
   0x3   :  { %4556 = sst [smem:[#allocation33_spill]] %s4548_s5 }
   0x4   :  { %12 = vsyncpa [#allocation4], 0 }
   0x5   :  { %14 = vsyncpa [#allocation4 + $0x1], 0 }
   0x6   :  { %15 = vsyncpa [#allocation7], 0 }
   0x7   :  { %16 = vsyncpa [#allocation5], 0 }
   0x8   :  { %18 = vsyncpa [#allocation5 + $0x1], 0  ;;  %s3427_s24 = smov 0   ;;  %s3429_s25 = smov 0  }
   0x9   :  { %s3431_s26 = smov 0   ;;  %s3433_s27 = smov 0  }
   0xa   :  { %s3435_s28 = smov 0   ;;  %s3437_s29 = smov 0  }
   0xb LB: > { %4557 = sst [smem:[#allocation28_spill]] %s3344_s28  ;;  %s3458_s30 = sadd.s32 4294967295, %s3348_s29   ;;  %s3348_s29 = sphi %s3437_s29, %s24_s29   ;;  %s3344_s28 = sphi %s3435_s28, %s4571_s28   ;;  %s3340_s27 = sphi %s3433_s27, %s4570_s27   ;;  %s3336_s26 = sphi %s3431_s26, %s4574_s26   ;;  %s3332_s25 = sphi %s3429_s25, %s4573_s25   ;;  %s3328_s24 = sphi %s3427_s24, %s4572_s24  }
   0xc   : > { %s2708_s8 = sadd.s32 4294967294, %s3348_s29   ;;  %s36_s9 = sadd.s32 1, %s3344_s28 }
   0xd   : > { %s45_s10 = sadd.s32 1, %s3336_s26  ;;  %p38_p0 = scmp.ge.s32.totalorder %s36_s9, 4 }
   0xe   : > { %p52_p1 = scmp.ne.s32.totalorder %s3336_s26, %s3332_s25  ;;  %p53_p2 = scmp.eq.s32.totalorder %s3348_s29, 0 }
   0xf   : > { %p58_p3 = scmp.ne.s32.totalorder %s3332_s25, %s3328_s24  ;;  %s4576_s9 = smov (%p38_p0, %s36_s9), 0 }
  0x10   : > { %4558 = sst [smem:[#allocation29_spill]] %s4576_s9  ;;  %p3470_p4 = por %p53_p2, %p52_p1 }
  0x11   : > { %p59_p5 = scmp.eq.s32.totalorder %s3458_s30, 0  ;;  %s41_s12 = ssub.s32 %s3344_s28, %s4576_s9 }
  0x12   : > { %p220_p6 = scmp.eq.s32.totalorder %s3458_s30, 3  ;;  %p43_p7 = scmp.eq.s32.totalorder %s41_s12, 0 }
  0x13   : > { %p3480_p8 = por %p59_p5, %p58_p3  ;;  %p226_p10 = scmp.eq.s32.totalorder %s2708_s8, 3 }
  0x14   : > { %p3484_p9 = por %p220_p6, %p52_p1  ;;  %p2709_p12 = scmp.ge.s32.totalorder %s3348_s29, 1 }
  0x15   : > { %s3489_s15 = scalar_select %p43_p7, %s3336_s26, %s45_s10  }
  0x16   : > { %p3491_p11 = por %p226_p10, %p58_p3  ;;  %p233_p13 = scmp.lt.s32.totalorder %s3348_s29, 5 }
  0x17   : > { %4562 = sst [smem:[#allocation30_spill]] %s3489_s15  ;;  %s3350_s21 = smov [#allocation6]  }
  0x18   : > { %s4564_s1 = sld [smem:[#allocation32_spill]]  ;;  %p3500_p0 = pnand %p2709_p12, %p233_p13 }
  0x19   : > { %s246_s22 = sshll.u32 %s3350_s21, 4  ;;  %s4566_s5 = sld [smem:[#allocation33_spill]]  ;;  %s247_s22 = int_to_ptr.vmem [resolvable:$true] %s246_s22 }
  0x1a   : > { %p2911_p1 = pneg %p3500_p0  ;;  %s3351_s12 = smov [#allocation10]  }
  0x1b   : > { %s263_s17 = sshll.u32 %s3351_s12, 4  ;;  %s3352_s18 = smov 128   ;;  %s264_s17 = int_to_ptr.vmem [resolvable:$true] %s263_s17 }
  0x1c   : > { %p2912_p2 = pnand %p2911_p1, %p59_p5  ;;  %p2712_p3 = scmp.ge.s32.totalorder %s3348_s29, 4 }
  0x1e   : > { %s244_s19 = sshll.u32 %s4564_s1, 4  ;;  %s3353_s1 = smov 8   ;;  %s245_s19 = int_to_ptr.hbm [resolvable:$true] %s244_s19 }
  0x1f   : > { %s261_s10 = sshll.u32 %s4566_s5, 4  ;;  %276 = sbr.rel (%p2712_p3) target bundleno = 76 (0x4c), region = 32  ;;  %s262_s10 = int_to_ptr.hbm [resolvable:$true] %s261_s10 }
  0x20   : > { %2914 = dma.hbm_to_vmem [thread:$0]  (!%p2912_p2), %s245_s19, 512, %s247_s22, [#allocation7], %s3352_s18, %s3352_s18, %s3353_s1  }
  0x21   : > { %2917 = dma.hbm_to_vmem [thread:$0]  (!%p2912_p2), %s262_s10, 512, %s264_s17, [#allocation7], %s3352_s18, %s3352_s18, %s3353_s1  }
  0x24   : > { %s280_s21 = sand.u32 1, %s3348_s29   ;;  %s4552_s23 = sand.u32 1, %s3336_s26  }
  0x25   : > { %s3516_s8 = sshll.u32 %s4552_s23, 6  ;;  %s3519_s19 = sshll.u32 %s3344_s28, 4 }
  0x26   : > { %s4567_s0 = sld [smem:[#allocation31_spill]]  ;;  %s284_s12 = scalar_lea.vmem [#allocation3], %s3516_s8 }
  0x27   : > { %s307_s17 = sshll.u32 %s284_s12, 4  ;;  %s3354_s23 = smov 1024   ;;  %s308_s17 = int_to_ptr.vmem [resolvable:$true] %s307_s17 }
  0x28   : > { %s2872_s18 = scalar_select %p3470_p4, [#allocation0], [#allocation20] }
  0x29   : > { %2873 = sst [smem:[#allocation13]] (%p3470_p4), %s3354_s23  ;;  %s3355_s28 = smov 256  }
  0x2a   : > { %s297_s9 = sld [smem:[%s2872_s18]]   ;;  %s3356_s1 = smov 2  }
  0x2b   : > { %2874 = sst [smem:[#allocation13 + $0x1]] (%p3470_p4), %s3355_s28  ;;  %s3357_s22 = smov 128  }
  0x2c   : > { %s292_s10 = scalar_lea.hbm %s4567_s0, %s3519_s19  ;;  %2875 = sst [smem:[#allocation13 + $0x2]] (%p3470_p4), %s3356_s1 }
  0x2d   : > { %s305_s5 = sshll.u32 %s292_s10, 4  ;;  %2876 = sst [smem:[#allocation13 + $0x3]] (%p3470_p4), %s3357_s22  ;;  %s306_s5 = int_to_ptr.hbm [resolvable:$true] %s305_s5 }
  0x2e   : > { %2877 = sst [smem:[#allocation13 + $0x4]] (%p3470_p4), %s3357_s22  ;;  %s3358_s0 = smov 8  }
  0x2f   : > { %2878 = sst [smem:[#allocation13 + $0x5]] (%p3470_p4), %s3358_s0  ;;  %s3540_s18 = scalar_lea.sflag [#allocation4], %s280_s21 }
  0x30   : > { %s2716_s12 = sshll.u32 %s297_s9, 26  ;;  %s3359_s23 = smov [#allocation12]  }
  0x31   : > { %s2717_s10 = sadd.s32 134217728, %s2716_s12 }
  0x32   : > { %2879 = dma.general (%p3470_p4), %s306_s5, 1024, %s308_s17, %s3540_s18, %s3359_s23, [#allocation13], %s2717_s10, 0  }
  0x33   : > { %s339_s9 = scalar_lea.hbm %s4546_s3, %s3519_s19  ;;  %s334_s21 = scalar_lea.vmem [#allocation8], %s3516_s8 }
  0x34   : > { %s2880_s1 = scalar_select %p3470_p4, [#allocation0], [#allocation21] }
  0x35   : > { %s352_s0 = sshll.u32 %s339_s9, 4  ;;  %s354_s22 = sshll.u32 %s334_s21, 4  ;;  %s353_s0 = int_to_ptr.hbm [resolvable:$true] %s352_s0  ;;  %s355_s22 = int_to_ptr.vmem [resolvable:$true] %s354_s22 }
  0x36   : > { %s344_s12 = sld [smem:[%s2880_s1]]   ;;  %s3360_s5 = smov 1024  }
  0x37   : > { %2881 = sst [smem:[#allocation15]] (%p3470_p4), %s3360_s5  ;;  %s3361_s15 = smov 256  }
  0x38   : > { %2882 = sst [smem:[#allocation15 + $0x1]] (%p3470_p4), %s3361_s15  ;;  %s3362_s17 = smov 2  }
  0x39   : > { %2883 = sst [smem:[#allocation15 + $0x2]] (%p3470_p4), %s3362_s17  ;;  %s3363_s10 = smov 128  }
  0x3a   : > { %2884 = sst [smem:[#allocation15 + $0x3]] (%p3470_p4), %s3363_s10  ;;  %s3364_s28 = smov 8  }
  0x3b   : > { %2885 = sst [smem:[#allocation15 + $0x4]] (%p3470_p4), %s3363_s10  ;;  %s3365_s9 = smov [#allocation14]  }
  0x3c   : > { %s2721_s8 = sshll.u32 %s344_s12, 26  ;;  %2886 = sst [smem:[#allocation15 + $0x5]] (%p3470_p4), %s3364_s28 }
  0x3d   : > { %s2722_s23 = sadd.s32 134217728, %s2721_s8 }
  0x3e   : > { %2887 = dma.general (%p3470_p4), %s353_s0, 1024, %s355_s22, %s3540_s18, %s3365_s9, [#allocation15], %s2722_s23, 0  }
  0x3f   : > { %s4568_s1 = sand.u32 1, %s3336_s26   ;;  %s386_s12 = scalar_lea.hbm %s4547_s4, %s3519_s19 }
  0x40   : > { %s2723_s21 = sshll.u32 %s4568_s1, 5  ;;  %s399_s17 = sshll.u32 %s386_s12, 4  ;;  %s400_s17 = int_to_ptr.hbm [resolvable:$true] %s399_s17 }
  0x41   : > { %s2888_s10 = scalar_select %p3470_p4, [#allocation0], [#allocation22] }
  0x42   : > { %s381_s8 = scalar_lea.vmem [#allocation9], %s2723_s21  ;;  %s3366_s23 = smov 1024  }
  0x43   : > { %s401_s0 = sshll.u32 %s381_s8, 4  ;;  %s391_s22 = sld [smem:[%s2888_s10]]   ;;  %s402_s0 = int_to_ptr.vmem [resolvable:$true] %s401_s0 }
  0x44   : > { %2889 = sst [smem:[#allocation17]] (%p3470_p4), %s3366_s23  ;;  %s3367_s28 = smov 256  }
  0x45   : > { %2890 = sst [smem:[#allocation17 + $0x1]] (%p3470_p4), %s3367_s28  ;;  %s3368_s9 = smov 2  }
  0x46   : > { %2891 = sst [smem:[#allocation17 + $0x2]] (%p3470_p4), %s3368_s9  ;;  %s3369_s19 = smov 128  }
  0x47   : > { %2892 = sst [smem:[#allocation17 + $0x3]] (%p3470_p4), %s3369_s19  ;;  %s3370_s5 = smov 8  }
  0x48   : > { %2893 = sst [smem:[#allocation17 + $0x4]] (%p3470_p4), %s3369_s19  ;;  %s3371_s15 = smov [#allocation16]  }
  0x49   : > { %s2726_s1 = sshll.u32 %s391_s22, 26  ;;  %2894 = sst [smem:[#allocation17 + $0x5]] (%p3470_p4), %s3370_s5 }
  0x4a   : > { %s2727_s21 = sadd.s32 134217728, %s2726_s1 }
  0x4b   : > { %2895 = dma.general (%p3470_p4), %s400_s17, 512, %s402_s0, %s3540_s18, %s3371_s15, [#allocation17], %s2727_s21, 0  }
  0x4c PF: > { %426 = sbr.rel (%p3500_p0) target bundleno = 1355 (0x54b), region = 48  ;;  %s428_s12 = sand.u32 (!%p3500_p0), 1, %s3458_s30  }
  0x4d   : > { %s3594_s10 = sand.u32 (!%p3500_p0), 1, %s3332_s25   ;;  %s429_s22 = scalar_lea.sflag (!%p3500_p0), [#allocation4], %s428_s12 }
  0x4e   : > { %s3597_s8 = sshll.u32 (!%p3500_p0), %s3594_s10, 6 }
  0x4f   : > { %s3600_s23 = scalar_lea.vmem (!%p3500_p0), [#allocation3], %s3597_s8 }
  0x51   : > { %3307 = dma.done.wait (%p3480_p8), %s429_s22, 1024  }
  0x52   : > { %3309 = vsyncadd (%p3480_p8), %s429_s22, 4294966272 }
  0x53   : > { %3311 = dma.done.wait (%p59_p5), [#allocation7], 512  }
  0x54   : > { %3313 = vsyncadd (%p59_p5), [#allocation7], 4294966784  ;;  %s3611_s11 = scalar_lea.vmem [#allocation8], %s3597_s8 }
  0x55   : > { %3315 = dma.done.wait (%p3480_p8), %s429_s22, 1536  }
  0x56   : > { %3317 = vsyncadd (%p3480_p8), %s429_s22, 4294965760  ;;  %s2732_s20 = sshll.u32 %s3594_s10, 5 }
  0x57   : > { %s3618_s18 = scalar_lea.vmem [#allocation9], %s2732_s20 }
  0x58   : > { %3319 = dma.done.wait (%p59_p5), [#allocation7], 512  }
  0x59   : > { %3321 = vsyncadd (%p59_p5), [#allocation7], 4294966784  ;;  %v517_v0 = vld [vmem:[#allocation6 + $0x18] sm:$0xff]  ;;  %v516_v1 = vld [vmem:[#allocation6 + $0x10] sm:$0xff]  ;;  %vm522_vm0 = vcmask 261120   ;;  %vm588_vm1 = vcmask 195584  }
  0x5a   : > { %559 = vmatpush.msra.mxu0 %v517_v0  ;;  %2856 = vmatpush.msra.mxu1 %v517_v0  ;;  %v515_v2 = vld [vmem:[#allocation6 + $0x8] sm:$0xff]  ;;  %v514_v3 = vld [vmem:[#allocation6] sm:$0xff]  ;;  %v508_v5 = vld [vmem:[%s3600_s23 + $0x10] sm:$0xff]  ;;  %s3372_s17 = smov 80   ;;  %s3373_s0 = smov 104   ;;  %vm742_vm2 = vcmask 64512  }
  0x5b   : > { %2857 = vmatpush.msra.mxu2 %v517_v0  ;;  %2858 = vmatpush.msra.mxu3 %v517_v0  ;;  %v506_v4 = vld [vmem:[%s3600_s23] sm:$0xff]  ;;  %v512_v7 = vld [vmem:[%s3600_s23 + $0x30] sm:$0xff]  ;;  %v507_v8 = vld [vmem:[%s3600_s23 + $0x8] sm:$0xff]  ;;  %s3374_s28 = smov 56   ;;  %s3375_s9 = smov 120   ;;  %vm1405_vm3 = vcmask 130048  }
  0x5c   : > { %560 = vmatpush.msra.mxu0 %v516_v1  ;;  %2859 = vmatpush.msra.mxu1 %v516_v1  ;;  %v510_v6 = vld [vmem:[%s3600_s23 + $0x20] sm:$0xff]  ;;  %v509_v9 = vld [vmem:[%s3600_s23 + $0x18] sm:$0xff]  ;;  %v511_v10 = vld [vmem:[%s3600_s23 + $0x28] sm:$0xff]  ;;  %s3376_s19 = smov 112   ;;  %s3377_s1 = smov 8  }
  0x5d   : > { %2860 = vmatpush.msra.mxu2 %v516_v1  ;;  %2861 = vmatpush.msra.mxu3 %v516_v1  ;;  %v513_v11 = vld [vmem:[%s3600_s23 + $0x38] sm:$0xff]  ;;  %v3092_v12 = vld [vmem:[%s4545_s2] ss:$0 sm:$0xff]  ;;  %s3378_s21 = smov 16   ;;  %s3379_s5 = smov 24  }
  0x5e   : > { %561 = vmatpush.msra.mxu0 %v515_v2  ;;  %2862 = vmatpush.msra.mxu1 %v515_v2  ;;  %s503_s22 = scalar_lea.vmem [#allocation11], %s3597_s8  ;;  %s2520_s8 = scalar_lea.sflag [#allocation5], %s3594_s10 }
  0x5f   : > { %2863 = vmatpush.msra.mxu2 %v515_v2  ;;  %2864 = vmatpush.msra.mxu3 %v515_v2 }
  0x60   : > { %562 = vmatpush.msra.mxu0 %v514_v3  ;;  %2865 = vmatpush.msra.mxu1 %v514_v3 }
  0x61   : > { %2735 = vmatmul.msk.f32.vlgmr.msra.gmra.mxu0 %vm522_vm0, %v506_v4  ;;  %2737 = vmatmul.msk.f32.vlgmr.msra.gmra.mxu1 %vm522_vm0, %v508_v5 }
  0x62   : > { %2866 = vmatpush.msra.mxu2 %v514_v3  ;;  %2867 = vmatpush.msra.mxu3 %v514_v3 }
  0x63   : > { %2739 = vmatmul.msk.f32.vlgmr.msra.gmra.mxu2 %vm522_vm0, %v510_v6  ;;  %2741 = vmatmul.msk.f32.vlgmr.msra.gmra.mxu3 %vm522_vm0, %v512_v7 }
  0x69   : > { %2736 = vmatmul.msk.f32.gmra.mxu0 %vm522_vm0, %v507_v8  ;;  %2738 = vmatmul.msk.f32.gmra.mxu1 %vm522_vm0, %v509_v9 }
  0x6b   : > { %2740 = vmatmul.msk.f32.gmra.mxu2 %vm522_vm0, %v511_v10  ;;  %2742 = vmatmul.msk.f32.gmra.mxu3 %vm522_vm0, %v513_v11 }
  0xde   : > { %v564_v13 = vpop.f32.mrf.mxu0  ;;  %v570_v14 = vpop.f32.mrf.mxu1 }
  0xdf   : > { %v565_v15 = vadd.f32 %v3092_v12, %v564_v13  ;;  %v571_v16 = vadd.f32 %v3092_v12, %v570_v14 }
  0xe1   : > { %589 = vst.msk [vmem:[#allocation2] sm:$0xff] %vm588_vm1, %v565_v15  ;;  %642 = vrot.lane.b32.xlu0 %v571_v16, %s3372_s17  ;;  %638 = vrot.lane.b32.xlu2 %v565_v15, %s3372_s17 }
  0xe2   : > { %591 = vst.msk [vmem:[#allocation2 + $0x10] sm:$0xff] %vm588_vm1, %v571_v16  ;;  %605 = vrot.lane.b32.xlu1 %v565_v15, %s3373_s0 }
  0xe6   : > { %v567_v17 = vpop.f32.mrf.mxu0  ;;  %v576_v18 = vpop.f32.mrf.mxu2 }
  0xe7   : > { %v568_v19 = vadd.f32 %v3092_v12, %v567_v17  ;;  %v3648_v20 = vadd.f32 %v3092_v12, %v576_v18  ;;  %v582_v21 = vpop.f32.mrf.mxu3  ;;  %v573_v22 = vpop.f32.mrf.mxu1 }
  0xe8   : > { %v3650_v23 = vadd.f32 %v3092_v12, %v582_v21  ;;  %v574_v24 = vadd.f32 %v3092_v12, %v573_v22  ;;  %v3675_v29 = vld [vmem:[#allocation2] sm:$0xff] }
  0xe9   : > { %590 = vst.msk [vmem:[#allocation2 + $0x8] sm:$0xff] %vm588_vm1, %v568_v19  ;;  %671 = vrot.lane.b32.xlu2 %v565_v15, %s3374_s28  ;;  %v3688_v31 = vld [vmem:[#allocation2 + $0x10] sm:$0xff] }
  0xea   : > { %593 = vst.msk [vmem:[#allocation2 + $0x20] sm:$0xff] %vm588_vm1, %v3648_v20  ;;  %617 = vrot.lane.b32.xlu0 %v3650_v23, %s3373_s0  ;;  %609 = vrot.lane.b32.xlu1 %v571_v16, %s3373_s0 }
  0xeb   : > { %595 = vst.msk [vmem:[#allocation2 + $0x30] sm:$0xff] %vm588_vm1, %v3650_v23 }
  0xec   : > { %592 = vst.msk [vmem:[#allocation2 + $0x18] sm:$0xff] %vm588_vm1, %v574_v24 }
  0xee   : > { %v579_v25 = vpop.f32.mrf.mxu2 }
  0xef   : > { %v3662_v26 = vadd.f32 %v3092_v12, %v579_v25  ;;  %v585_v27 = vpop.f32.mrf.mxu3 }
  0xf0   : > { %v3664_v28 = vadd.f32 %v3092_v12, %v585_v27  ;;  %v3696_v32 = vld [vmem:[#allocation2 + $0x8] sm:$0xff] }
  0xf1   : > { %594 = vst.msk [vmem:[#allocation2 + $0x28] sm:$0xff] %vm588_vm1, %v3662_v26  ;;  %640 = vrot.lane.b32.xlu2 %v568_v19, %s3372_s17  ;;  %v3681_v30 = vld [vmem:[#allocation2 + $0x20] sm:$0xff] }
  0xf2   : > { %646 = vrot.lane.b32.xlu0 %v3648_v20, %s3372_s17  ;;  %613 = vrot.lane.b32.xlu1 %v3648_v20, %s3373_s0  ;;  %596 = vst.msk [vmem:[#allocation2 + $0x38] sm:$0xff] %vm588_vm1, %v3664_v28  ;;  %v3698_v33 = vld [vmem:[#allocation2 + $0x30] sm:$0xff] }
  0xf3   : > { %v3707_v35 = vld [vmem:[#allocation2 + $0x18] sm:$0xff] }
  0xf8   : > { %v3705_v34 = vld [vmem:[#allocation2 + $0x28] sm:$0xff] }
  0xf9   : > { %738 = vrot.lane.b32.xlu2 %v3675_v29, %s3375_s9  ;;  %v3714_v36 = vld [vmem:[#allocation2 + $0x38] sm:$0xff] }
  0xfa   : > { %607 = vrot.lane.b32.xlu0 %v568_v19, %s3373_s0  ;;  %673 = vrot.lane.b32.xlu1 %v568_v19, %s3374_s28 }
 0x101   : > { %619 = vrot.lane.b32.xlu2 %v3664_v28, %s3373_s0 }
 0x102   : > { %611 = vrot.lane.b32.xlu0 %v574_v24, %s3373_s0  ;;  %813 = vrot.lane.b32.xlu1 %v3681_v30, %s3375_s9 }
 0x109   : > { %652 = vrot.lane.b32.xlu2 %v3664_v28, %s3372_s17 }
 0x10a   : > { %776 = vrot.lane.b32.xlu0 %v3688_v31, %s3375_s9  ;;  %648 = vrot.lane.b32.xlu1 %v3662_v26, %s3372_s17 }
 0x111   : > { %740 = vrot.lane.b32.xlu2 %v3696_v32, %s3375_s9 }
 0x112   : > { %644 = vrot.lane.b32.xlu0 %v574_v24, %s3372_s17  ;;  %850 = vrot.lane.b32.xlu1 %v3698_v33, %s3375_s9 }
 0x119   : > { %815 = vrot.lane.b32.xlu2 %v3705_v34, %s3375_s9 }
 0x11a   : > { %677 = vrot.lane.b32.xlu0 %v574_v24, %s3374_s28  ;;  %778 = vrot.lane.b32.xlu1 %v3707_v35, %s3375_s9 }
 0x121   : > { %852 = vrot.lane.b32.xlu2 %v3714_v36, %s3375_s9 }
 0x122   : > { %615 = vrot.lane.b32.xlu0 %v3662_v26, %s3373_s0 }
 0x129   : > { %650 = vrot.lane.b32.xlu2 %v3650_v23, %s3372_s17 }
 0x12a   : > { %675 = vrot.lane.b32.xlu0 %v571_v16, %s3374_s28 }
 0x13b   : > { %v639_v37 = vpop.permute.xlu2 %638 }
 0x13c   : > { %663 = vst.msk [vmem:[#allocation2 + $0x80] sm:$0xff] %vm588_vm1, %v639_v37 }
 0x143   : > { %v672_v38 = vpop.permute.xlu2 %671  ;;  %v3724_v39 = vld [vmem:[#allocation2 + $0x80] sm:$0xff] }
 0x144   : > { %696 = vst.msk [vmem:[#allocation2 + $0xc0] sm:$0xff] %vm588_vm1, %v672_v38  ;;  %1035 = vrot.lane.b32.xlu2 %v3724_v39, %s3375_s9 }
 0x14b   : > { %v641_v40 = vpop.permute.xlu2 %640  ;;  %v3833_v16 = vld [vmem:[#allocation2 + $0xc0] sm:$0xff] }
 0x14c   : > { %664 = vst.msk [vmem:[#allocation2 + $0x88] sm:$0xff] %vm588_vm1, %v641_v40 }
 0x153   : > { %v643_v41 = vpop.permute.xlu0 %642  ;;  %v739_v42 = vpop.permute.xlu2 %738  ;;  %v3778_v2 = vld [vmem:[#allocation2 + $0x88] sm:$0xff] }
 0x154   : > { %665 = vst.msk [vmem:[#allocation2 + $0x90] sm:$0xff] %vm588_vm1, %v643_v41  ;;  %v606_v43 = vpop.permute.xlu1 %605 }
 0x155   : > { %630 = vst.msk [vmem:[#allocation2 + $0x40] sm:$0xff] %vm588_vm1, %v606_v43 }
 0x15b   : > { %v620_v44 = vpop.permute.xlu2 %619  ;;  %v3797_v7 = vld [vmem:[#allocation2 + $0x90] sm:$0xff] }
 0x15c   : > { %v618_v45 = vpop.permute.xlu0 %617  ;;  %v610_v46 = vpop.permute.xlu1 %609  ;;  %637 = vst.msk [vmem:[#allocation2 + $0x78] sm:$0xff] %vm588_vm1, %v620_v44  ;;  %v3733_v47 = vld [vmem:[#allocation2 + $0x40] sm:$0xff]  ;;  %v3052_v43 = vpack.i.bf16 %v3833_v16, %v3797_v7 }
 0x15d   : > { %636 = vst.msk [vmem:[#allocation2 + $0x70] sm:$0xff] %vm588_vm1, %v618_v45  ;;  %887 = vrot.lane.b32.xlu0 %v3733_v47, %s3375_s9 }
 0x15e   : > { %632 = vst.msk [vmem:[#allocation2 + $0x50] sm:$0xff] %vm588_vm1, %v610_v46  ;;  %v3022_v46 = vpack.i.bf16 %v3733_v47, %v3688_v31 }
 0x163   : > { %v653_v48 = vpop.permute.xlu2 %652  ;;  %v3843_v19 = vld [vmem:[#allocation2 + $0x78] sm:$0xff] }
 0x164   : > { %v647_v49 = vpop.permute.xlu0 %646  ;;  %v614_v50 = vpop.permute.xlu1 %613  ;;  %670 = vst.msk [vmem:[#allocation2 + $0xb8] sm:$0xff] %vm588_vm1, %v653_v48  ;;  %v3805_v9 = vld [vmem:[#allocation2 + $0x70] sm:$0xff] }
 0x165   : > { %667 = vst.msk [vmem:[#allocation2 + $0xa0] sm:$0xff] %vm588_vm1, %v647_v49  ;;  %679 = vrot.lane.b32.xlu0 %v3648_v20, %s3374_s28  ;;  %v3743_v51 = vld [vmem:[#allocation2 + $0x50] sm:$0xff]  ;;  %v3027_v20 = vpack.i.bf16 %v3681_v30, %v3705_v34 }
 0x166   : > { %634 = vst.msk [vmem:[#allocation2 + $0x60] sm:$0xff] %vm588_vm1, %v614_v50  ;;  %924 = vrot.lane.b32.xlu1 %v3743_v51, %s3375_s9 }
 0x16b   : > { %v741_v52 = vpop.permute.xlu2 %740  ;;  %v3839_v17 = vld [vmem:[#allocation2 + $0xb8] sm:$0xff] }
 0x16c   : > { %v608_v53 = vpop.permute.xlu0 %607  ;;  %v674_v54 = vpop.permute.xlu1 %673  ;;  %2743 = vmatpush.xpose.msk.msrb.mxu1 %vm742_vm2, %v741_v52  ;;  %v3812_v10 = vld [vmem:[#allocation2 + $0xa0] sm:$0xff] }
 0x16d   : > { %631 = vst.msk [vmem:[#allocation2 + $0x48] sm:$0xff] %vm588_vm1, %v608_v53  ;;  %685 = vrot.lane.b32.xlu0 %v3664_v28, %s3374_s28  ;;  %v3790_v6 = vld [vmem:[#allocation2 + $0x60] sm:$0xff] }
 0x16e   : > { %697 = vst.msk [vmem:[#allocation2 + $0xc8] sm:$0xff] %vm588_vm1, %v674_v54 }
 0x170   : > { %2744 = vmatpush.xpose.msk.msrb.mxu1 %vm742_vm2, %v739_v42  ;;  %v3012_v42 = vpack.i.bf16 %v3675_v29, %v3696_v32 }
 0x173   : > { %2745 = vmatmul.msk.f32.vlgmr.msrb.gmra.mxu1 %vm742_vm2, %v3675_v29  ;;  %v816_v55 = vpop.permute.xlu2 %815  ;;  %v3042_v29 = vpack.i.bf16 %v3790_v6, %v3698_v33 }
 0x174   : > { %v612_v56 = vpop.permute.xlu0 %611  ;;  %v814_v57 = vpop.permute.xlu1 %813  ;;  %v3756_v58 = vld [vmem:[#allocation2 + $0x48] sm:$0xff]  ;;  %2751 = vmatpush.xpose.msk.msrb.mxu3 %vm742_vm2, %v816_v55 }
 0x175   : > { %633 = vst.msk [vmem:[#allocation2 + $0x58] sm:$0xff] %vm588_vm1, %v612_v56  ;;  %889 = vrot.lane.b32.xlu1 %v3756_v58, %s3375_s9  ;;  %v3823_v13 = vld [vmem:[#allocation2 + $0xc8] sm:$0xff] }
 0x178   : > { %2752 = vmatpush.xpose.msk.msrb.mxu3 %vm742_vm2, %v814_v57  ;;  %v3057_v57 = vpack.i.bf16 %v3812_v10, %v3805_v9 }
 0x17b   : > { %2746 = vmatmul.msk.f32.gmra.mxu1 %vm742_vm2, %v3696_v32  ;;  %2753 = vmatmul.msk.f32.vlgmr.msrb.gmra.mxu3 %vm742_vm2, %v3681_v30  ;;  %v853_v59 = vpop.permute.xlu2 %852 }
 0x17c   : > { %v777_v60 = vpop.permute.xlu0 %776  ;;  %v649_v61 = vpop.permute.xlu1 %648  ;;  %v3767_v62 = vld [vmem:[#allocation2 + $0x58] sm:$0xff]  ;;  %2755 = vmatpush.xpose.msk.msra.mxu1 %vm742_vm2, %v853_v59 }
 0x17d   : > { %668 = vst.msk [vmem:[#allocation2 + $0xa8] sm:$0xff] %vm588_vm1, %v649_v61  ;;  %681 = vrot.lane.b32.xlu1 %v3662_v26, %s3374_s28  ;;  %926 = vrot.lane.b32.xlu2 %v3767_v62, %s3375_s9  ;;  %v3032_v41 = vpack.i.bf16 %v3778_v2, %v3767_v62  ;;  %v1329_v61 = vld [vmem:[%s3611_s11] sm:$0xff] }
 0x183   : > { %2754 = vmatmul.msk.f32.gmra.mxu3 %vm742_vm2, %v3705_v34  ;;  %v651_v63 = vpop.permute.xlu2 %650  ;;  %v3017_v34 = vpack.i.bf16 %v3756_v58, %v3707_v35 }
 0x184   : > { %v645_v0 = vpop.permute.xlu0 %644  ;;  %v851_v1 = vpop.permute.xlu1 %850  ;;  %669 = vst.msk [vmem:[#allocation2 + $0xb0] sm:$0xff] %vm588_vm1, %v651_v63  ;;  %v3841_v18 = vld [vmem:[#allocation2 + $0xa8] sm:$0xff] }
 0x185   : > { %666 = vst.msk [vmem:[#allocation2 + $0x98] sm:$0xff] %vm588_vm1, %v645_v0  ;;  %1037 = vrot.lane.b32.xlu1 %v3778_v2, %s3375_s9  ;;  %683 = vrot.lane.b32.xlu2 %v3650_v23, %s3374_s28 }
 0x186   : > { %2756 = vmatpush.xpose.msk.msra.mxu1 %vm742_vm2, %v851_v1 }
 0x189   : > { %2757 = vmatmul.msk.f32.vlgmr.msra.gmra.mxu1 %vm742_vm2, %v3698_v33 }
 0x18b   : > { %v3854_v21 = vld [vmem:[#allocation2 + $0xb0] sm:$0xff] }
 0x18c   : > { %v678_v3 = vpop.permute.xlu0 %677  ;;  %v779_v4 = vpop.permute.xlu1 %778  ;;  %v3788_v5 = vld [vmem:[#allocation2 + $0x98] sm:$0xff] }
 0x18d   : > { %699 = vst.msk [vmem:[#allocation2 + $0xd8] sm:$0xff] %vm588_vm1, %v678_v3  ;;  %1074 = vrot.lane.b32.xlu0 %v3788_v5, %s3375_s9  ;;  %961 = vrot.lane.b32.xlu1 %v3790_v6, %s3375_s9 }
 0x18e   : > { %2747 = vmatpush.xpose.msk.msrb.mxu2 %vm742_vm2, %v779_v4  ;;  %1072 = vrot.lane.b32.xlu2 %v3797_v7, %s3375_s9 }
 0x191   : > { %2758 = vmatmul.msk.f32.gmra.mxu1 %vm742_vm2, %v3714_v36 }
 0x192   : > { %2748 = vmatpush.xpose.msk.msrb.mxu2 %vm742_vm2, %v777_v60 }
 0x194   : > { %v616_v8 = vpop.permute.xlu0 %615  ;;  %v3827_v14 = vld [vmem:[#allocation2 + $0xd8] sm:$0xff] }
 0x195   : > { %635 = vst.msk [vmem:[#allocation2 + $0x68] sm:$0xff] %vm588_vm1, %v616_v8  ;;  %2749 = vmatmul.msk.f32.vlgmr.msrb.gmra.mxu2 %vm742_vm2, %v3688_v31  ;;  %998 = vrot.lane.b32.xlu1 %v3805_v9, %s3375_s9  ;;  %v3037_v31 = vpack.i.bf16 %v3724_v39, %v3743_v51  ;;  %v1330_v8 = vld [vmem:[%s3611_s11 + $0x8] sm:$0xff] }
 0x196   : > { %1109 = vrot.lane.b32.xlu2 %v3812_v10, %s3375_s9 }
 0x19c   : > { %v676_v11 = vpop.permute.xlu0 %675  ;;  %v3816_v12 = vld [vmem:[#allocation2 + $0x68] sm:$0xff] }
 0x19d   : > { %698 = vst.msk [vmem:[#allocation2 + $0xd0] sm:$0xff] %vm588_vm1, %v676_v11  ;;  %2750 = vmatmul.msk.f32.gmra.mxu2 %vm742_vm2, %v3707_v35  ;;  %963 = vrot.lane.b32.xlu0 %v3816_v12, %s3375_s9  ;;  %v3067_v53 = vpack.i.bf16 %v3816_v12, %v3714_v36  ;;  %v3072_v36 = vpack.i.bf16 %v3841_v18, %v3843_v19 }
 0x19e   : > { %1185 = vrot.lane.b32.xlu1 %v3823_v13, %s3375_s9  ;;  %v1036_v22 = vpop.permute.xlu2 %1035 }
 0x1a4   : > { %v3829_v15 = vld [vmem:[#allocation2 + $0xd0] sm:$0xff] }
 0x1a5   : > { %1222 = vrot.lane.b32.xlu0 %v3827_v14, %s3375_s9  ;;  %1220 = vrot.lane.b32.xlu2 %v3829_v15, %s3375_s9  ;;  %v3062_v63 = vpack.i.bf16 %v3829_v15, %v3827_v14 }
 0x1a6   : > { %1183 = vrot.lane.b32.xlu1 %v3833_v16, %s3375_s9 }
 0x1ad   : > { %1111 = vrot.lane.b32.xlu0 %v3841_v18, %s3375_s9  ;;  %1000 = vrot.lane.b32.xlu2 %v3843_v19, %s3375_s9 }
 0x1ae   : > { %1148 = vrot.lane.b32.xlu1 %v3839_v17, %s3375_s9 }
 0x1b5   : > { %3028 = vrot.lane.b32.xlu0 %v3027_v20, %s3376_s19 }
 0x1b6   : > { %1146 = vrot.lane.b32.xlu1 %v3854_v21, %s3375_s9 }
 0x1cf   : > { %v888_v23 = vpop.permute.xlu0 %887 }
 0x1d7   : > { %v680_v24 = vpop.permute.xlu0 %679  ;;  %v927_v25 = vpop.permute.xlu2 %926 }
 0x1d8   : > { %700 = vst.msk [vmem:[#allocation2 + $0xe0] sm:$0xff] %vm588_vm1, %v680_v24  ;;  %2763 = vmatpush.xpose.msk.msra.mxu3 %vm742_vm2, %v927_v25  ;;  %v925_v26 = vpop.permute.xlu1 %924  ;;  %v3998_v25 = vld [vmem:[%s3618_s18 + $0x10] sm:$0xff] }
 0x1dc   : > { %2764 = vmatpush.xpose.msk.msra.mxu3 %vm742_vm2, %v925_v26 }
 0x1df   : > { %v686_v27 = vpop.permute.xlu0 %685  ;;  %2765 = vmatmul.msk.f32.vlgmr.msra.gmra.mxu3 %vm742_vm2, %v3743_v51  ;;  %v684_v28 = vpop.permute.xlu2 %683  ;;  %v3863_v30 = vld [vmem:[#allocation2 + $0xe0] sm:$0xff] }
 0x1e0   : > { %703 = vst.msk [vmem:[#allocation2 + $0xf8] sm:$0xff] %vm588_vm1, %v686_v27  ;;  %1257 = vrot.lane.b32.xlu2 %v3863_v30, %s3375_s9 }
 0x1e1   : > { %702 = vst.msk [vmem:[#allocation2 + $0xf0] sm:$0xff] %vm588_vm1, %v684_v28 }
 0x1e7   : > { %v890_v37 = vpop.permute.xlu1 %889  ;;  %2766 = vmatmul.msk.f32.gmra.mxu3 %vm742_vm2, %v3767_v62  ;;  %v3914_v33 = vld [vmem:[#allocation2 + $0xf8] sm:$0xff] }
 0x1e8   : > { %2759 = vmatpush.xpose.msk.msra.mxu2 %vm742_vm2, %v890_v37  ;;  %3018 = vrot.lane.b32.xlu2 %v3017_v34, %s3376_s19  ;;  %v3875_v38 = vld [vmem:[#allocation2 + $0xf0] sm:$0xff]  ;;  %v1073_v40 = vpop.permute.xlu2 %1072 }
 0x1e9   : > { %1294 = vrot.lane.b32.xlu1 %v3875_v38, %s3375_s9 }
 0x1ec   : > { %2760 = vmatpush.xpose.msk.msra.mxu2 %vm742_vm2, %v888_v23  ;;  %v3992_v23 = vld [vmem:[%s3618_s18 + $0x8] sm:$0xff] }
 0x1ef   : > { %2761 = vmatmul.msk.f32.vlgmr.msra.gmra.mxu2 %vm742_vm2, %v3733_v47  ;;  %v682_v35 = vpop.permute.xlu1 %681 }
 0x1f0   : > { %701 = vst.msk [vmem:[#allocation2 + $0xe8] sm:$0xff] %vm588_vm1, %v682_v35  ;;  %3033 = vrot.lane.b32.xlu2 %v3032_v41, %s3376_s19  ;;  %v1110_v48 = vpop.permute.xlu2 %1109  ;;  %v768_v60 = vpop.f32.mrf.mxu1 }
 0x1f1   : > { %3013 = vrot.lane.b32.xlu1 %v3012_v42, %s3376_s19  ;;  %v1337_v1 = vadd.f32 %v1329_v61, %v768_v60 }
 0x1f7   : > { %2762 = vmatmul.msk.f32.gmra.mxu2 %vm742_vm2, %v3756_v58  ;;  %v1038_v44 = vpop.permute.xlu1 %1037  ;;  %v3893_v45 = vld [vmem:[#allocation2 + $0xe8] sm:$0xff] }
 0x1f8   : > { %1259 = vrot.lane.b32.xlu0 %v3893_v45, %s3375_s9  ;;  %3053 = vrot.lane.b32.xlu2 %v3052_v43, %s3376_s19  ;;  %v3077_v49 = vpack.i.bf16 %v3893_v45, %v3839_v17 }
 0x1f9   : > { %2775 = vmatpush.xpose.msk.msrb.mxu3 %vm742_vm2, %v1038_v44  ;;  %3023 = vrot.lane.b32.xlu1 %v3022_v46, %s3376_s19 }
 0x1fd   : > { %2776 = vmatpush.xpose.msk.msrb.mxu3 %vm742_vm2, %v1036_v22 }
 0x1fe   : > { %v842_v3 = vpop.f32.mrf.mxu3 }
 0x1ff   : > { %v962_v32 = vpop.permute.xlu1 %961  ;;  %v1221_v47 = vpop.permute.xlu2 %1220  ;;  %v1341_v42 = vadd.f32 %v1329_v61, %v842_v3 }
 0x200   : > { %2777 = vmatmul.msk.f32.vlgmr.msrb.gmra.mxu3 %vm742_vm2, %v3724_v39  ;;  %3043 = vrot.lane.b32.xlu0 %v3042_v29, %s3376_s19  ;;  %v1075_v50 = vpop.permute.xlu0 %1074  ;;  %v3047_v39 = vpack.i.bf16 %v3823_v13, %v3788_v5 }
 0x201   : > { %3078 = vrot.lane.b32.xlu2 %v3077_v49, %s3376_s19  ;;  %3038 = vrot.lane.b32.xlu1 %v3037_v31, %s3376_s19  ;;  %v4032_v31 = vld [vmem:[%s3611_s11 + $0x10] sm:$0xff] }
 0x207   : > { %v999_v52 = vpop.permute.xlu1 %998  ;;  %v1001_v51 = vpop.permute.xlu2 %1000 }
 0x208   : > { %2778 = vmatmul.msk.f32.gmra.mxu3 %vm742_vm2, %v3778_v2  ;;  %1296 = vrot.lane.b32.xlu0 %v3914_v33, %s3375_s9  ;;  %v3959_v2 = vld [vmem:[%s3618_s18] sm:$0xff] }
 0x209   : > { %3068 = vrot.lane.b32.xlu1 %v3067_v53, %s3376_s19  ;;  %2771 = vmatpush.xpose.msk.msrb.mxu2 %vm742_vm2, %v1001_v51  ;;  %v3965_v4 = vadd.f32 %v3959_v2, %v1337_v1  ;;  %v4022_v44 = vadd.f32 %v3959_v2, %v1341_v42 }
 0x20d   : > { %2772 = vmatpush.xpose.msk.msrb.mxu2 %vm742_vm2, %v999_v52 }
 0x20f   : > { %v964_v54 = vpop.permute.xlu0 %963 }
 0x210   : > { %v1186_v55 = vpop.permute.xlu1 %1185  ;;  %2773 = vmatmul.msk.f32.vlgmr.msrb.gmra.mxu2 %vm742_vm2, %v3805_v9  ;;  %3048 = vrot.lane.b32.xlu0 %v3047_v39, %s3376_s19 }
 0x211   : > { %2767 = vmatpush.xpose.msk.msrb.mxu1 %vm742_vm2, %v964_v54  ;;  %2791 = vmatpush.xpose.msk.msrb.mxu0 %vm742_vm2, %v1186_v55 }
 0x212   : > { %3073 = vrot.lane.b32.xlu1 %v3072_v36, %s3376_s19 }
 0x215   : > { %2768 = vmatpush.xpose.msk.msrb.mxu1 %vm742_vm2, %v962_v32 }
 0x217   : > { %v1223_v56 = vpop.permute.xlu0 %1222 }
 0x218   : > { %v1184_v58 = vpop.permute.xlu1 %1183  ;;  %2769 = vmatmul.msk.f32.vlgmr.msrb.gmra.mxu1 %vm742_vm2, %v3790_v6  ;;  %2774 = vmatmul.msk.f32.gmra.mxu2 %vm742_vm2, %v3843_v19  ;;  %v805_v59 = vpop.f32.mrf.mxu2 }
 0x219   : > { %2779 = vmatpush.xpose.msk.msra.mxu1 %vm742_vm2, %v1075_v50  ;;  %3058 = vrot.lane.b32.xlu0 %v3057_v57, %s3376_s19  ;;  %v1339_v22 = vadd.f32 %v1329_v61, %v805_v59 }
 0x21a   : > { %2792 = vmatpush.xpose.msk.msrb.mxu0 %vm742_vm2, %v1184_v58 }
 0x21d   : > { %2780 = vmatpush.xpose.msk.msra.mxu1 %vm742_vm2, %v1073_v40  ;;  %2793 = vmatmul.msk.f32.vlgmr.msrb.gmra.mxu0 %vm742_vm2, %v3833_v16  ;;  %v845_v16 = vpop.f32.mrf.mxu3 }
 0x21e   : > { %v1342_v19 = vadd.f32 %v1330_v8, %v845_v16 }
 0x21f   : > { %v1112_v62 = vpop.permute.xlu0 %1111 }
 0x220   : > { %v1149_v0 = vpop.permute.xlu1 %1148  ;;  %2770 = vmatmul.msk.f32.gmra.mxu1 %vm742_vm2, %v3816_v12  ;;  %2783 = vmatpush.xpose.msk.msra.mxu2 %vm742_vm2, %v1112_v62  ;;  %v808_v6 = vpop.f32.mrf.mxu2  ;;  %v1406_v12 = vsel %vm1405_vm3, %v3965_v4, -inf  ;;  %v3995_v24 = vadd.f32 %v3992_v23, %v1342_v19 }
 0x221   : > { %2795 = vmatpush.xpose.msk.msrb.mxu1 %vm742_vm2, %v1223_v56  ;;  %3063 = vrot.lane.b32.xlu0 %v3062_v63, %s3376_s19  ;;  %v1340_v11 = vadd.f32 %v1330_v8, %v808_v6 }
 0x222   : > { %2787 = vmatpush.xpose.msk.msra.mxu3 %vm742_vm2, %v1149_v0  ;;  %v1421_v26 = vsel %vm1405_vm3, %v3995_v24, -inf }
 0x224   : > { %2784 = vmatpush.xpose.msk.msra.mxu2 %vm742_vm2, %v1110_v48  ;;  %v1418_v48 = vsel %vm1405_vm3, %v4022_v44, -inf }
 0x225   : > { %2796 = vmatpush.xpose.msk.msrb.mxu1 %vm742_vm2, %v1221_v47  ;;  %2794 = vmatmul.msk.f32.gmra.mxu0 %vm742_vm2, %v3823_v13  ;;  %v3978_v13 = vld [vmem:[%s3618_s18 + $0x18] sm:$0xff] }
 0x227   : > { %2785 = vmatmul.msk.f32.vlgmr.msra.gmra.mxu2 %vm742_vm2, %v3812_v10  ;;  %v3981_v10 = vadd.f32 %v3978_v13, %v1340_v11  ;;  %v3029_v47 = vpop.permute.xlu0 %3028 }
 0x228   : > { %v1147_v9 = vpop.permute.xlu1 %1146  ;;  %2781 = vmatmul.msk.f32.vlgmr.msra.gmra.mxu1 %vm742_vm2, %v3797_v7  ;;  %v771_v7 = vpop.f32.mrf.mxu1  ;;  %v3030_v62 = vunpack.i.l.bf16 %v3029_v47  ;;  %v3031_v63 = vunpack.i.h.bf16 %v3029_v47 }
 0x229   : > { %2788 = vmatpush.xpose.msk.msra.mxu3 %vm742_vm2, %v1147_v9  ;;  %v1415_v20 = vsel %vm1405_vm3, %v3981_v10, -inf  ;;  %v1338_v37 = vadd.f32 %v1330_v8, %v771_v7 }
 0x22a   : > { %1407 = vmax.xlane.f32.xlu2 %v1406_v12 }
 0x22b   : > { %v4017_v35 = vadd.f32 %v3992_v23, %v1338_v37 }
 0x22c   : > { %2789 = vmatmul.msk.f32.vlgmr.msra.gmra.mxu3 %vm742_vm2, %v3854_v21 }
 0x22d   : > { %v1409_v43 = vsel %vm1405_vm3, %v4017_v35, -inf }
 0x22f   : > { %2786 = vmatmul.msk.f32.gmra.mxu2 %vm742_vm2, %v3841_v18  ;;  %v4001_v18 = vadd.f32 %v3998_v25, %v1339_v22 }
 0x230   : > { %2782 = vmatmul.msk.f32.gmra.mxu1 %vm742_vm2, %v3788_v5  ;;  %v879_v5 = vpop.f32.mrf.mxu1 }
 0x231   : > { %v1412_v28 = vsel %vm1405_vm3, %v4001_v18, -inf }
 0x232   : > { %1416 = vmax.xlane.f32.xlu2 %v1415_v20 }
 0x234   : > { %2790 = vmatmul.msk.f32.gmra.mxu3 %vm742_vm2, %v3839_v17  ;;  %v1343_v17 = vadd.f32 %v1329_v61, %v879_v5 }
 0x236   : > { %v4010_v34 = vadd.f32 %v3998_v25, %v1343_v17 }
 0x238   : > { %2797 = vmatmul.msk.f32.vlgmr.msrb.gmra.mxu1 %vm742_vm2, %v3829_v15  ;;  %v1424_v15 = vsel %vm1405_vm3, %v4010_v34, -inf }
 0x23a   : > { %1422 = vmax.xlane.f32.xlu2 %v1421_v26  ;;  %v1258_v27 = vpop.permute.xlu2 %1257 }
 0x23c   : > { %1413 = vmax.xlane.f32.xlu1 %v1412_v28 }
 0x240   : > { %2798 = vmatmul.msk.f32.gmra.mxu1 %vm742_vm2, %v3827_v14  ;;  %v882_v14 = vpop.f32.mrf.mxu1 }
 0x241   : > { %v1344_v46 = vadd.f32 %v1330_v8, %v882_v14  ;;  %v4051_v8 = vld [vmem:[%s3611_s11 + $0x18] sm:$0xff]  ;;  %v4081_v14 = vld [vmem:[%s3611_s11 + $0x30] sm:$0xff] }
 0x242   : > { %v3019_v40 = vpop.permute.xlu2 %3018 }
 0x243   : > { %v3020_v41 = vunpack.i.l.bf16 %v3019_v40  ;;  %v4027_v29 = vadd.f32 %v3978_v13, %v1344_v46  ;;  %v3021_v55 = vunpack.i.h.bf16 %v3019_v40 }
 0x244   : > { %1425 = vmax.xlane.f32.xlu1 %v1424_v15 }
 0x245   : > { %1755 = vmatpush.msra.mxu1 %v3020_v41  ;;  %v1427_v32 = vsel %vm1405_vm3, %v4027_v29, -inf }
 0x24a   : > { %v4040_v56 = vpop.permute.xlu2 %3033 }
 0x24b   : > { %1410 = vmax.xlane.f32.xlu0 %v1409_v43  ;;  %v3035_v61 = vunpack.i.l.bf16 %v4040_v56 }
 0x252   : > { %v4072_v28 = vpop.permute.xlu2 %3053 }
 0x253   : > { %1419 = vmax.xlane.f32.xlu0 %v1418_v48 }
 0x25b   : > { %1428 = vmax.xlane.f32.xlu0 %v1427_v32  ;;  %v1295_v49 = vpop.permute.xlu1 %1294  ;;  %v4077_v15 = vpop.permute.xlu2 %3078 }
 0x262   : > { %v953_v50 = vpop.f32.mrf.mxu3 }
 0x263   : > { %v1347_v52 = vadd.f32 %v4032_v31, %v953_v50  ;;  %v3014_v53 = vpop.permute.xlu1 %3013 }
 0x264   : > { %v3015_v51 = vunpack.i.l.bf16 %v3014_v53  ;;  %v3016_v54 = vunpack.i.h.bf16 %v3014_v53 }
 0x265   : > { %v4036_v39 = vadd.f32 %v3998_v25, %v1347_v52 }
 0x266   : > { %1720 = vmatpush.msra.mxu0 %v3015_v51 }
 0x267   : > { %v1436_v36 = vsel %vm1405_vm3, %v4036_v39, -inf }
 0x268   : > { %1721 = vmatpush.msra.mxu0 %v3016_v54  ;;  %1437 = vmax.xlane.f32.xlu0 %v1436_v36 }
 0x26a   : > { %1860 = vmatpush.msrb.mxu0 %v3021_v55  ;;  %v1260_v57 = vpop.permute.xlu0 %1259  ;;  %v956_v42 = vpop.f32.mrf.mxu3 }
 0x26b   : > { %v3024_v58 = vpop.permute.xlu1 %3023  ;;  %2799 = vmatpush.xpose.msk.msrb.mxu2 %vm742_vm2, %v1260_v57  ;;  %v1348_v32 = vadd.f32 %v4051_v8, %v956_v42 }
 0x26c   : > { %v3026_v59 = vunpack.i.h.bf16 %v3024_v58  ;;  %v3025_v60 = vunpack.i.l.bf16 %v3024_v58 }
 0x26d   : > { %v4094_v54 = vadd.f32 %v3978_v13, %v1348_v32 }
 0x26e   : > { %1756 = vmatpush.msra.mxu1 %v3025_v60  ;;  %1861 = vmatpush.msrb.mxu0 %v3026_v59  ;;  %v4102_v60 = vld [vmem:[%s3611_s11 + $0x20] sm:$0xff] }
 0x26f   : > { %2800 = vmatpush.xpose.msk.msrb.mxu2 %vm742_vm2, %v1258_v27 }
 0x270   : > { %1895 = vmatpush.msrb.mxu1 %v3035_v61 }
 0x272   : > { %v916_v0 = vpop.f32.mrf.mxu2  ;;  %v3044_v1 = vpop.permute.xlu0 %3043  ;;  %2801 = vmatmul.msk.f32.vlgmr.msrb.gmra.mxu2 %vm742_vm2, %v3863_v30 }
 0x273   : > { %1790 = vmatpush.msra.mxu2 %v3030_v62  ;;  %v4047_v3 = vpop.permute.xlu1 %3038  ;;  %v3046_v20 = vunpack.i.h.bf16 %v3044_v1  ;;  %v1345_v55 = vadd.f32 %v4032_v31, %v916_v0 }
 0x274   : > { %v3040_v6 = vunpack.i.l.bf16 %v4047_v3 }
 0x275   : > { %1791 = vmatpush.msra.mxu2 %v3031_v63  ;;  %v1439_v63 = vsel %vm1405_vm3, %v4094_v54, -inf }
 0x276   : > { %1896 = vmatpush.msrb.mxu1 %v3040_v6  ;;  %v4113_v6 = vadd.f32 %v3959_v2, %v1345_v55 }
 0x27a   : > { %v919_v9 = vpop.f32.mrf.mxu2  ;;  %v1297_v11 = vpop.permute.xlu0 %1296  ;;  %2802 = vmatmul.msk.f32.gmra.mxu2 %vm742_vm2, %v3893_v45  ;;  %v3045_v45 = vunpack.i.l.bf16 %v3044_v1 }
 0x27b   : > { %v1346_v12 = vadd.f32 %v4051_v8, %v919_v9  ;;  %v3069_v16 = vpop.permute.xlu1 %3068  ;;  %2803 = vmatpush.xpose.msk.msrb.mxu3 %vm742_vm2, %v1297_v11  ;;  %v4116_v11 = vld [vmem:[%s3611_s11 + $0x38] sm:$0xff] }
 0x27c   : > { %v3071_v7 = vunpack.i.h.bf16 %v3069_v16  ;;  %v3070_v22 = vunpack.i.l.bf16 %v3069_v16 }
 0x27d   : > { %v4058_v19 = vadd.f32 %v3992_v23, %v1346_v12 }
 0x27e   : > { %1930 = vmatpush.msrb.mxu2 %v3071_v7  ;;  %v1430_v7 = vsel %vm1405_vm3, %v4113_v6, -inf }
 0x27f   : > { %2804 = vmatpush.xpose.msk.msrb.mxu3 %vm742_vm2, %v1295_v49  ;;  %v1433_v5 = vsel %vm1405_vm3, %v4058_v19, -inf }
 0x280   : > { %1931 = vmatpush.msrb.mxu2 %v3046_v20  ;;  %1434 = vmax.xlane.f32.xlu0 %v1433_v5  ;;  %v3036_v5 = vunpack.i.h.bf16 %v4040_v56 }
 0x282   : > { %v4063_v26 = vpop.permute.xlu0 %3048  ;;  %2805 = vmatmul.msk.f32.vlgmr.msrb.gmra.mxu3 %vm742_vm2, %v3875_v38 }
 0x283   : > { %1825 = vmatpush.msra.mxu3 %v3070_v22  ;;  %v1064_v59 = vpop.f32.mrf.mxu3 }
 0x284   : > { %v4067_v27 = vpop.permute.xlu1 %3073  ;;  %v1353_v0 = vadd.f32 %v4102_v60, %v1064_v59 }
 0x285   : > { %1826 = vmatpush.msra.mxu3 %v3045_v45  ;;  %v3075_v17 = vunpack.i.l.bf16 %v4067_v27  ;;  %v3041_v45 = vunpack.i.h.bf16 %v4047_v3 }
 0x286   : > { %v4122_v20 = vadd.f32 %v3959_v2, %v1353_v0 }
 0x287   : > { %1965 = vmatpush.msrb.mxu3 %v3075_v17 }
 0x28a   : > { %2806 = vmatmul.msk.f32.gmra.mxu3 %vm742_vm2, %v3914_v33 }
 0x28b   : > { %v4074_v37 = vpop.permute.xlu0 %3058  ;;  %v1067_v32 = vpop.f32.mrf.mxu3 }
 0x28c   : > { %v3060_v40 = vunpack.i.l.bf16 %v4074_v37 }
 0x28e   : > { %1966 = vmatpush.msrb.mxu3 %v3060_v40  ;;  %v1454_v40 = vsel %vm1405_vm3, %v4122_v20, -inf }
 0x293   : > { %v1027_v46 = vpop.f32.mrf.mxu2  ;;  %v4160_v0 = vpop.permute.xlu0 %3063 }
 0x295   : > { %v990_v41 = vpop.f32.mrf.mxu1 }
 0x296   : > { %v1349_v43 = vadd.f32 %v4032_v31, %v990_v41 }
 0x298   : > { %v4084_v48 = vadd.f32 %v3959_v2, %v1349_v43  ;;  %v4137_v43 = vld [vmem:[%s3611_s11 + $0x28] sm:$0xff] }
 0x29a   : > { %v1212_v49 = vpop.f32.mrf.mxu0  ;;  %v1442_v50 = vsel %vm1405_vm3, %v4084_v48, -inf }
 0x29b   : > { %v1361_v47 = vadd.f32 %v4081_v14, %v1212_v49  ;;  %1443 = vmax.xlane.f32.xlu1 %v1442_v50  ;;  %v1030_v1 = vpop.f32.mrf.mxu2  ;;  %v1351_v49 = vadd.f32 %v4032_v31, %v1027_v46 }
 0x29d   : > { %v4091_v52 = vadd.f32 %v3959_v2, %v1361_v47  ;;  %v993_v53 = vpop.f32.mrf.mxu1  ;;  %v1408_v51 = vpop.xlane.xlu2 %1407  ;;  %v4156_v59 = vadd.f32 %v3998_v25, %v1351_v49  ;;  %v3055_v49 = vunpack.i.l.bf16 %v4072_v28 }
 0x29e   : > { %v1350_v36 = vadd.f32 %v4051_v8, %v993_v53  ;;  %v1502_v57 = vsub.f32 %v3965_v4, %v1408_v51 }
 0x29f   : > { %v1478_v58 = vsel %vm1405_vm3, %v4091_v52, -inf }
 0x2a0   : > { %1479 = vmax.xlane.f32.xlu2 %v1478_v58  ;;  %v1534_v61 = vmul.f32 1.442695, %v1502_v57  ;;  %v4105_v62 = vadd.f32 %v3992_v23, %v1350_v36  ;;  %v1354_v57 = vadd.f32 %v4137_v43, %v1067_v32 }
 0x2a2   : > { %3094 = vpow2.f32 %v1534_v61  ;;  %v1445_v4 = vsel %vm1405_vm3, %v4105_v62, -inf  ;;  %v1215_v9 = vpop.f32.mrf.mxu0  ;;  %v1352_v61 = vadd.f32 %v4051_v8, %v1030_v1 }
 0x2a3   : > { %1446 = vmax.xlane.f32.xlu0 %v1445_v4  ;;  %1440 = vmax.xlane.f32.xlu1 %v1439_v63  ;;  %v1362_v16 = vadd.f32 %v4116_v11, %v1215_v9 }
 0x2a5   : > { %v1101_v12 = vpop.f32.mrf.mxu1  ;;  %v4134_v42 = vadd.f32 %v3992_v23, %v1362_v16  ;;  %v1417_v51 = vpop.xlane.xlu2 %1416  ;;  %v4166_v16 = vadd.f32 %v3992_v23, %v1354_v57 }
 0x2a6   : > { %v1355_v17 = vadd.f32 %v4102_v60, %v1101_v12  ;;  %v1505_v63 = vsub.f32 %v3981_v10, %v1417_v51  ;;  %v1448_v12 = vsel %vm1405_vm3, %v4156_v59, -inf  ;;  %v4169_v10 = vadd.f32 %v3978_v13, %v1352_v61 }
 0x2a7   : > { %v1481_v47 = vsel %vm1405_vm3, %v4134_v42, -inf }
 0x2a8   : > { %1431 = vmax.xlane.f32.xlu2 %v1430_v7  ;;  %v4124_v22 = vpop.eup %3094  ;;  %v4144_v50 = vadd.f32 %v3998_v25, %v1355_v17  ;;  %v1540_v7 = vmul.f32 1.442695, %v1505_v63  ;;  %v3080_v63 = vunpack.i.l.bf16 %v4077_v15 }
 0x2a9   : > { %2807 = vmatmul.msk.f32.vlgmr.msra.gmra.mxu0 %vm1405_vm3, %v4124_v22 }
 0x2aa   : > { %2000 = vmatpush.msra.mxu0 %v3036_v5  ;;  %v1138_v41 = vpop.f32.mrf.mxu2  ;;  %v1460_v31 = vsel %vm1405_vm3, %v4144_v50, -inf }
 0x2ab   : > { %1455 = vmax.xlane.f32.xlu0 %v1454_v40  ;;  %v1457_v40 = vsel %vm1405_vm3, %v4166_v16, -inf }
 0x2ac   : > { %2001 = vmatpush.msra.mxu0 %v3041_v45  ;;  %v3050_v45 = vunpack.i.l.bf16 %v4063_v26 }
 0x2ad   : > { %v1104_v56 = vpop.f32.mrf.mxu1 }
 0x2ae   : > { %v1356_v3 = vadd.f32 %v4137_v43, %v1104_v56 }
 0x2af   : > { %v1414_v53 = vpop.xlane.xlu1 %1413 }
 0x2b0   : > { %1482 = vmax.xlane.f32.xlu2 %v1481_v47  ;;  %v1504_v55 = vsub.f32 %v4001_v18, %v1414_v53  ;;  %v4148_v36 = vadd.f32 %v3978_v13, %v1356_v3  ;;  %v1357_v3 = vadd.f32 %v4102_v60, %v1138_v41  ;;  %v1175_v41 = vpop.f32.mrf.mxu3 }
 0x2b2   : > { %v1538_v58 = vmul.f32 1.442695, %v1504_v55  ;;  %v1463_v46 = vsel %vm1405_vm3, %v4148_v36, -inf  ;;  %v1141_v18 = vpop.f32.mrf.mxu2 }
 0x2b3   : > { %1461 = vmax.xlane.f32.xlu0 %v1460_v31  ;;  %1464 = vmax.xlane.f32.xlu1 %v1463_v46  ;;  %v1358_v4 = vadd.f32 %v4137_v43, %v1141_v18 }
 0x2b4   : > { %3096 = vpow2.f32 %v1538_v58  ;;  %v4194_v58 = vadd.f32 %v3959_v2, %v1357_v3 }
 0x2b5   : > { %v1249_v9 = vpop.f32.mrf.mxu1  ;;  %v4178_v56 = vadd.f32 %v3992_v23, %v1358_v4  ;;  %3098 = vpow2.f32 %v1540_v7  ;;  %v1359_v4 = vadd.f32 %v4102_v60, %v1175_v41  ;;  %v1423_v7 = vpop.xlane.xlu2 %1422 }
 0x2b6   : > { %v1363_v32 = vadd.f32 %v4081_v14, %v1249_v9  ;;  %v1466_v9 = vsel %vm1405_vm3, %v4194_v58, -inf  ;;  %v1507_v60 = vsub.f32 %v3995_v24, %v1423_v7 }
 0x2b7   : > { %v1426_v5 = vpop.xlane.xlu1 %1425  ;;  %v1469_v53 = vsel %vm1405_vm3, %v4178_v56, -inf }
 0x2b8   : > { %1449 = vmax.xlane.f32.xlu2 %v1448_v12  ;;  %v1508_v8 = vsub.f32 %v4010_v34, %v1426_v5  ;;  %v1451_v34 = vsel %vm1405_vm3, %v4169_v10, -inf  ;;  %v4191_v55 = vadd.f32 %v3998_v25, %v1363_v32 }
 0x2ba   : > { %v4172_v1 = vpop.eup %3096  ;;  %v1546_v17 = vmul.f32 1.442695, %v1508_v8 }
 0x2bb   : > { %2809 = vmatmul.msk.f32.vlgmr.msra.gmra.mxu1 %vm1405_vm3, %v4172_v1  ;;  %1458 = vmax.xlane.f32.xlu0 %v1457_v40  ;;  %v3099_v31 = vpop.eup %3098 }
 0x2bc   : > { %3100 = vpow2.f32 %v1546_v17  ;;  %2035 = vmatpush.msra.mxu1 %v3050_v45  ;;  %1452 = vmax.xlane.f32.xlu1 %v1451_v34  ;;  %v4213_v45 = vadd.f32 %v3998_v25, %v1359_v4  ;;  %v1544_v34 = vmul.f32 1.442695, %v1507_v60  ;;  %v3065_v4 = vunpack.i.l.bf16 %v4160_v0 }
 0x2bd   : > { %v1252_v57 = vpop.f32.mrf.mxu1 }
 0x2be   : > { %2036 = vmatpush.msra.mxu1 %v3055_v49  ;;  %v1411_v47 = vpop.xlane.xlu0 %1410  ;;  %v1364_v18 = vadd.f32 %v4116_v11, %v1252_v57 }
 0x2bf   : > { %v1503_v51 = vsub.f32 %v4017_v35, %v1411_v47  ;;  %v1484_v35 = vsel %vm1405_vm3, %v4191_v55, -inf }
 0x2c0   : > { %1470 = vmax.xlane.f32.xlu2 %v1469_v53  ;;  %v4210_v8 = vadd.f32 %v3978_v13, %v1364_v18  ;;  %v3076_v53 = vunpack.i.h.bf16 %v4067_v27  ;;  %v1607_v18 = vsel %vm1405_vm3, %v3099_v31, 0.0 }
 0x2c1   : > { %v1536_v46 = vmul.f32 1.442695, %v1503_v51  ;;  %v3061_v51 = vunpack.i.h.bf16 %v4074_v37 }
 0x2c2   : > { %v4196_v61 = vpop.eup %3100  ;;  %v1487_v32 = vsel %vm1405_vm3, %v4210_v8, -inf }
 0x2c3   : > { %3102 = vpow2.f32 %v1536_v46  ;;  %2810 = vmatmul.msk.f32.gmra.mxu1 %vm1405_vm3, %v3099_v31  ;;  %2813 = vmatmul.msk.f32.vlgmr.msra.gmra.mxu3 %vm1405_vm3, %v4196_v61  ;;  %v1604_v46 = vsel %vm1405_vm3, %v4172_v1, 0.0  ;;  %v1178_v1 = vpop.f32.mrf.mxu3 }
 0x2c4   : > { %2105 = vmatpush.msra.mxu3 %v3080_v63  ;;  %1485 = vmax.xlane.f32.xlu1 %v1484_v35 }
 0x2c5   : > { %1467 = vmax.xlane.f32.xlu0 %v1466_v9  ;;  %v1360_v9 = vadd.f32 %v4137_v43, %v1178_v1 }
 0x2c6   : > { %v1420_v12 = vpop.xlane.xlu0 %1419 }
 0x2c7   : > { %v1506_v5 = vsub.f32 %v4022_v44, %v1420_v12  ;;  %v1472_v44 = vsel %vm1405_vm3, %v4213_v45, -inf }
 0x2c9   : > { %v3103_v17 = vpop.eup %3102  ;;  %v1542_v40 = vmul.f32 1.442695, %v1506_v5 }
 0x2ca   : > { %2808 = vmatmul.msk.f32.gmra.mxu0 %vm1405_vm3, %v3103_v17  ;;  %v1601_v57 = vsel %vm1405_vm3, %v3103_v17, 0.0 }
 0x2cb   : > { %3104 = vpow2.f32 %v1542_v40 }
 0x2cc   : > { %1488 = vmax.xlane.f32.xlu1 %v1487_v32  ;;  %3106 = vpow2.f32 %v1544_v34 }
 0x2cd   : > { %1473 = vmax.xlane.f32.xlu0 %v1472_v44 }
 0x2ce   : > { %v1429_v49 = vpop.xlane.xlu0 %1428 }
 0x2cf   : > { %v1509_v3 = vsub.f32 %v4027_v29, %v1429_v49  ;;  %v3087_v29 = vpack.i.bf16 %v3875_v38, %v3914_v33  ;;  %v3082_v33 = vpack.i.bf16 %v3863_v30, %v3854_v21  ;;  %v4255_v30 = vadd.f32 %v3978_v13, %v1360_v9 }
 0x2d1   : > { %v4222_v47 = vpop.eup %3104  ;;  %v1548_v24 = vmul.f32 1.442695, %v1509_v3  ;;  %v1475_v12 = vsel %vm1405_vm3, %v4255_v30, -inf  ;;  %v1598_v3 = vsel %vm1405_vm3, %v4124_v22, 0.0 }
 0x2d2   : > { %2811 = vmatmul.msk.f32.vlgmr.msra.gmra.mxu2 %vm1405_vm3, %v4222_v47  ;;  %v4232_v41 = vpop.eup %3106 }
 0x2d3   : > { %3108 = vpow2.f32 %v1548_v24  ;;  %2070 = vmatpush.msra.mxu2 %v3076_v53 }
 0x2d5   : > { %1602 = vadd.xlane.f32.xlu0 %v1601_v57  ;;  %2071 = vmatpush.msra.mxu2 %v3061_v51 }
 0x2d8   : > { %3088 = vrot.lane.b32.xlu2 %v3087_v29, %s3376_s19 }
 0x2d9   : > { %v4234_v27 = vpop.eup %3108 }
 0x2da   : > { %2812 = vmatmul.msk.f32.gmra.mxu2 %vm1405_vm3, %v4232_v41  ;;  %2814 = vmatmul.msk.f32.gmra.mxu3 %vm1405_vm3, %v4234_v27 }
 0x2db   : > { %v1438_v37 = vpop.xlane.xlu0 %1437 }
 0x2dc   : > { %v1512_v63 = vsub.f32 %v4036_v39, %v1438_v37  ;;  %v3066_v39 = vunpack.i.h.bf16 %v4160_v0  ;;  %v1610_v37 = vsel %vm1405_vm3, %v4222_v47, 0.0 }
 0x2dd   : > { %1605 = vadd.xlane.f32.xlu0 %v1604_v46 }
 0x2de   : > { %v1554_v38 = vmul.f32 1.442695, %v1512_v63 }
 0x2e0   : > { %3110 = vpow2.f32 %v1554_v38  ;;  %v3081_v38 = vunpack.i.h.bf16 %v4077_v15 }
 0x2e5   : > { %1608 = vadd.xlane.f32.xlu0 %v1607_v18  ;;  %3083 = vrot.lane.b32.xlu1 %v3082_v33, %s3376_s19 }
 0x2e6   : > { %v4247_v35 = vpop.eup %3110 }
 0x2e7   : > { %2817 = vmatmul.msk.f32.vlgmr.msrb.gmra.mxu1 %vm1405_vm3, %v4247_v35 }
 0x2e8   : > { %2175 = vmatpush.msrb.mxu1 %v3065_v4 }
 0x2ea   : > { %2176 = vmatpush.msrb.mxu1 %v3066_v39 }
 0x2f3   : > { %v1435_v34 = vpop.xlane.xlu0 %1434 }
 0x2f4   : > { %v1511_v15 = vsub.f32 %v4058_v19, %v1435_v34 }
 0x2f5   : > { %v1286_v21 = vpop.f32.mrf.mxu2 }
 0x2f6   : > { %v1365_v31 = vadd.f32 %v4081_v14, %v1286_v21 }
 0x2f8   : > { %v4261_v7 = vadd.f32 %v3959_v2, %v1365_v31 }
 0x2fa   : > { %v1490_v43 = vsel %vm1405_vm3, %v4261_v7, -inf }
 0x2fd   : > { %v1289_v5 = vpop.f32.mrf.mxu2 }
 0x2fe   : > { %v1366_v40 = vadd.f32 %v4116_v11, %v1289_v5  ;;  %v1552_v5 = vmul.f32 1.442695, %v1511_v15 }
 0x300   : > { %v4273_v2 = vadd.f32 %v3992_v23, %v1366_v40 }
 0x301   : > { %1476 = vmax.xlane.f32.xlu2 %v1475_v12 }
 0x305   : > { %v1323_v0 = vpop.f32.mrf.mxu3 }
 0x306   : > { %v1367_v17 = vadd.f32 %v4081_v14, %v1323_v0 }
 0x308   : > { %v4268_v60 = vadd.f32 %v3998_v25, %v1367_v17  ;;  %v1493_v25 = vsel %vm1405_vm3, %v4273_v2, -inf  ;;  %v3051_v17 = vunpack.i.h.bf16 %v4063_v26 }
 0x309   : > { %1491 = vmax.xlane.f32.xlu2 %v1490_v43 }
 0x30a   : > { %v1496_v32 = vsel %vm1405_vm3, %v4268_v60, -inf }
 0x30b   : > { %1497 = vmax.xlane.f32.xlu0 %v1496_v32 }
 0x30d   : > { %v1326_v44 = vpop.f32.mrf.mxu3 }
 0x30e   : > { %v1368_v14 = vadd.f32 %v4116_v11, %v1326_v44  ;;  %v1444_v49 = vpop.xlane.xlu1 %1443  ;;  %v3056_v44 = vunpack.i.h.bf16 %v4072_v28 }
 0x30f   : > { %v1514_v53 = vsub.f32 %v4084_v48, %v1444_v49  ;;  %1599 = vadd.xlane.f32.xlu1 %v1598_v3 }
 0x310   : > { %v4282_v24 = vadd.f32 %v3978_v13, %v1368_v14 }
 0x311   : > { %1494 = vmax.xlane.f32.xlu2 %v1493_v25  ;;  %v1558_v23 = vmul.f32 1.442695, %v1514_v53 }
 0x312   : > { %v1499_v57 = vsel %vm1405_vm3, %v4282_v24, -inf }
 0x313   : > { %v1480_v51 = vpop.xlane.xlu2 %1479  ;;  %3112 = vpow2.f32 %v1558_v23  ;;  %1500 = vmax.xlane.f32.xlu0 %v1499_v57 }
 0x314   : > { %v1526_v11 = vsub.f32 %v4091_v52, %v1480_v51 }
 0x316   : > { %v1582_v22 = vmul.f32 1.442695, %v1526_v11  ;;  %v1447_v29 = vpop.xlane.xlu0 %1446  ;;  %v1441_v48 = vpop.xlane.xlu1 %1440 }
 0x317   : > { %v1515_v46 = vsub.f32 %v4105_v62, %v1447_v29  ;;  %v1513_v13 = vsub.f32 %v4094_v54, %v1441_v48  ;;  %1611 = vadd.xlane.f32.xlu1 %v1610_v37 }
 0x318   : > { %3114 = vpow2.f32 %v1582_v22  ;;  %v1628_v22 = vsel %vm1405_vm3, %v4247_v35, 0.0 }
 0x319   : > { %v3113_v63 = vpop.eup %3112  ;;  %v1560_v33 = vmul.f32 1.442695, %v1515_v46  ;;  %v1556_v18 = vmul.f32 1.442695, %v1513_v13 }
 0x31a   : > { %2819 = vmatmul.msk.f32.vlgmr.msrb.gmra.mxu2 %vm1405_vm3, %v3113_v63  ;;  %v1634_v54 = vsel %vm1405_vm3, %v3113_v63, 0.0 }
 0x31b   : > { %v1432_v52 = vpop.xlane.xlu2 %1431  ;;  %3116 = vpow2.f32 %v1560_v33  ;;  %2210 = vmatpush.msrb.mxu2 %v3081_v38 }
 0x31c   : > { %v1510_v4 = vsub.f32 %v4113_v6, %v1432_v52  ;;  %3118 = vpow2.f32 %v1556_v18 }
 0x31e   : > { %v4294_v47 = vpop.eup %3114  ;;  %v1550_v39 = vmul.f32 1.442695, %v1510_v4  ;;  %v1456_v62 = vpop.xlane.xlu0 %1455 }
 0x31f   : > { %v1670_v1 = vsel %vm1405_vm3, %v4294_v47, 0.0  ;;  %v1518_v9 = vsub.f32 %v4122_v20, %v1456_v62  ;;  %1635 = vadd.xlane.f32.xlu1 %v1634_v54 }
 0x320   : > { %3120 = vpow2.f32 %v1550_v39  ;;  %1671 = vadd.xlane.f32.xlu2 %v1670_v1 }
 0x321   : > { %v4301_v21 = vpop.eup %3116  ;;  %v1566_v6 = vmul.f32 1.442695, %v1518_v9 }
 0x322   : > { %v3119_v31 = vpop.eup %3118  ;;  %2820 = vmatmul.msk.f32.gmra.mxu2 %vm1405_vm3, %v4301_v21 }
 0x323   : > { %v1483_v12 = vpop.xlane.xlu2 %1482  ;;  %2818 = vmatmul.msk.f32.gmra.mxu1 %vm1405_vm3, %v3119_v31  ;;  %3122 = vpow2.f32 %v1566_v6  ;;  %v1631_v43 = vsel %vm1405_vm3, %v3119_v31, 0.0 }
 0x324   : > { %v1527_v19 = vsub.f32 %v4134_v42, %v1483_v12  ;;  %3124 = vpow2.f32 %v1552_v5 }
 0x326   : > { %v3121_v0 = vpop.eup %3120  ;;  %v1462_v20 = vpop.xlane.xlu0 %1461  ;;  %v1584_v14 = vmul.f32 1.442695, %v1527_v19 }
 0x327   : > { %v1465_v40 = vpop.xlane.xlu1 %1464  ;;  %2815 = vmatmul.msk.f32.vlgmr.msrb.gmra.mxu0 %vm1405_vm3, %v3121_v0  ;;  %v1622_v32 = vsel %vm1405_vm3, %v3121_v0, 0.0  ;;  %v1520_v34 = vsub.f32 %v4144_v50, %v1462_v20  ;;  %1632 = vadd.xlane.f32.xlu1 %v1631_v43 }
 0x328   : > { %2140 = vmatpush.msrb.mxu0 %v3051_v17  ;;  %1623 = vadd.xlane.f32.xlu0 %v1622_v32  ;;  %v1521_v3 = vsub.f32 %v4148_v36, %v1465_v40 }
 0x329   : > { %v1570_v26 = vmul.f32 1.442695, %v1520_v34  ;;  %v3123_v49 = vpop.eup %3122 }
 0x32a   : > { %2141 = vmatpush.msrb.mxu0 %v3056_v44  ;;  %v3125_v25 = vpop.eup %3124  ;;  %v1646_v51 = vsel %vm1405_vm3, %v3123_v49, 0.0  ;;  %v1572_v50 = vmul.f32 1.442695, %v1521_v3 }
 0x32b   : > { %v1450_v42 = vpop.xlane.xlu2 %1449  ;;  %3126 = vpow2.f32 %v1570_v26  ;;  %v1625_v15 = vsel %vm1405_vm3, %v3125_v25, 0.0 }
 0x32c   : > { %v1516_v53 = vsub.f32 %v4156_v59, %v1450_v42  ;;  %3128 = vpow2.f32 %v1584_v14 }
 0x32e   : > { %v1562_v23 = vmul.f32 1.442695, %v1516_v53  ;;  %v1459_v28 = vpop.xlane.xlu0 %1458 }
 0x32f   : > { %2816 = vmatmul.msk.f32.gmra.mxu0 %vm1405_vm3, %v3125_v25  ;;  %v1519_v57 = vsub.f32 %v4166_v16, %v1459_v28  ;;  %v1453_v11 = vpop.xlane.xlu1 %1452  ;;  %1647 = vadd.xlane.f32.xlu1 %v1646_v51 }
 0x330   : > { %3130 = vpow2.f32 %v1562_v23  ;;  %v1517_v36 = vsub.f32 %v4169_v10, %v1453_v11  ;;  %1629 = vadd.xlane.f32.xlu0 %v1628_v22 }
 0x331   : > { %v4321_v59 = vpop.eup %3126  ;;  %3132 = vpow2.f32 %v1572_v50  ;;  %v1568_v48 = vmul.f32 1.442695, %v1519_v57 }
 0x332   : > { %v1564_v29 = vmul.f32 1.442695, %v1517_v36  ;;  %2825 = vmatmul.msk.f32.vlgmr.msra.gmra.mxu1 %vm1405_vm3, %v4321_v59  ;;  %v3129_v37 = vpop.eup %3128 }
 0x333   : > { %v1673_v35 = vsel %vm1405_vm3, %v3129_v37, 0.0  ;;  %v1471_v13 = vpop.xlane.xlu2 %1470 }
 0x334   : > { %3134 = vpow2.f32 %v1564_v29  ;;  %v1523_v39 = vsub.f32 %v4178_v56, %v1471_v13 }
 0x335   : > { %3136 = vpow2.f32 %v1568_v48 }
 0x336   : > { %v3131_v46 = vpop.eup %3130 }
 0x337   : > { %2821 = vmatmul.msk.f32.vlgmr.msrb.gmra.mxu3 %vm1405_vm3, %v3131_v46  ;;  %2823 = vmatmul.msk.f32.vlgmr.msra.gmra.mxu0 %vm1405_vm3, %v3123_v49  ;;  %v1640_v16 = vsel %vm1405_vm3, %v3131_v46, 0.0  ;;  %v1486_v10 = vpop.xlane.xlu1 %1485  ;;  %v4330_v33 = vpop.eup %3132 }
 0x338   : > { %1641 = vadd.xlane.f32.xlu2 %v1640_v16  ;;  %v1528_v63 = vsub.f32 %v4191_v55, %v1486_v10  ;;  %v1468_v38 = vpop.xlane.xlu0 %1467  ;;  %1674 = vadd.xlane.f32.xlu0 %v1673_v35  ;;  %v1576_v55 = vmul.f32 1.442695, %v1523_v39  ;;  %v1758_v34 = vpop.f32.mrf.mxu1  ;;  %v1655_v11 = vsel %vm1405_vm3, %v4330_v33, 0.0 }
 0x339   : > { %v1522_v18 = vsub.f32 %v4194_v58, %v1468_v38 }
 0x33a   : > { %v3135_v52 = vpop.eup %3134  ;;  %v1586_v4 = vmul.f32 1.442695, %v1528_v63  ;;  %2826 = vmatmul.msk.f32.gmra.mxu1 %vm1405_vm3, %v4330_v33 }
 0x33b   : > { %v1574_v62 = vmul.f32 1.442695, %v1522_v18  ;;  %v1643_v54 = vsel %vm1405_vm3, %v3135_v52, 0.0  ;;  %v3137_v1 = vpop.eup %3136  ;;  %v3089_v14 = vpop.permute.xlu2 %3088 }
 0x33c   : > { %3138 = vpow2.f32 %v1586_v4  ;;  %1644 = vadd.xlane.f32.xlu1 %v1643_v54  ;;  %v1649_v49 = vsel %vm1405_vm3, %v3137_v1, 0.0  ;;  %v3090_v28 = vunpack.i.l.bf16 %v3089_v14  ;;  %v3091_v51 = vunpack.i.h.bf16 %v3089_v14 }
 0x33d   : > { %3140 = vpow2.f32 %v1574_v62 }
 0x33e   : > { %3142 = vpow2.f32 %v1576_v55 }
 0x33f   : > { %2822 = vmatmul.msk.f32.gmra.mxu3 %vm1405_vm3, %v3135_v52  ;;  %2824 = vmatmul.msk.f32.gmra.mxu0 %vm1405_vm3, %v3137_v1  ;;  %v1489_v58 = vpop.xlane.xlu1 %1488 }
 0x340   : > { %v1529_v9 = vsub.f32 %v4210_v8, %v1489_v58  ;;  %v1474_v6 = vpop.xlane.xlu0 %1473  ;;  %1626 = vadd.xlane.f32.xlu0 %v1625_v15  ;;  %v1637_v8 = vsel %vm1405_vm3, %v4301_v21, 0.0  ;;  %v1761_v57 = vpop.f32.mrf.mxu1 }
 0x341   : > { %v1524_v56 = vsub.f32 %v4213_v45, %v1474_v6  ;;  %v4384_v6 = vpop.f32.mrf.mxu0 }
 0x342   : > { %v3139_v31 = vpop.eup %3138  ;;  %v1588_v12 = vmul.f32 1.442695, %v1529_v9 }
 0x343   : > { %v3141_v5 = vpop.eup %3140  ;;  %v1578_v0 = vmul.f32 1.442695, %v1524_v56  ;;  %2833 = vmatmul.msk.f32.vlgmr.msrb.gmra.mxu1 %vm1405_vm3, %v3139_v31  ;;  %v1676_v17 = vsel %vm1405_vm3, %v3139_v31, 0.0 }
 0x344   : > { %3144 = vpow2.f32 %v1588_v12  ;;  %2827 = vmatmul.msk.f32.vlgmr.msra.gmra.mxu2 %vm1405_vm3, %v3141_v5  ;;  %1677 = vadd.xlane.f32.xlu2 %v1676_v17  ;;  %v3143_v19 = vpop.eup %3142  ;;  %v1658_v36 = vsel %vm1405_vm3, %v3141_v5, 0.0 }
 0x345   : > { %3146 = vpow2.f32 %v1578_v0  ;;  %v1661_v44 = vsel %vm1405_vm3, %v3143_v19, 0.0 }
 0x347   : > { %2831 = vmatmul.msk.f32.vlgmr.msrb.gmra.mxu0 %vm1405_vm3, %v4294_v47  ;;  %v1652_v47 = vsel %vm1405_vm3, %v4321_v59, 0.0 }
 0x348   : > { %v4349_v45 = vpop.xlane.xlu0 %1602  ;;  %1638 = vadd.xlane.f32.xlu0 %v1637_v8 }
 0x349   : > { %v4389_v5 = vpop.f32.mrf.mxu0 }
 0x34a   : > { %v3145_v20 = vpop.eup %3144 }
 0x34b   : > { %v3147_v40 = vpop.eup %3146  ;;  %2834 = vmatmul.msk.f32.gmra.mxu1 %vm1405_vm3, %v3145_v20  ;;  %v1679_v43 = vsel %vm1405_vm3, %v3145_v20, 0.0 }
 0x34c   : > { %2828 = vmatmul.msk.f32.gmra.mxu2 %vm1405_vm3, %v3143_v19  ;;  %v1664_v32 = vsel %vm1405_vm3, %v3147_v40, 0.0  ;;  %1680 = vadd.xlane.f32.xlu2 %v1679_v43 }
 0x34d   : > { %1665 = vadd.xlane.f32.xlu1 %v1664_v32 }
 0x34f   : > { %2832 = vmatmul.msk.f32.gmra.mxu0 %vm1405_vm3, %v3129_v37 }
 0x350   : > { %v1606_v21 = vpop.xlane.xlu0 %1605  ;;  %1653 = vadd.xlane.f32.xlu0 %v1652_v47 }
 0x351   : > { %3148 = vrcp.f32 %v1606_v21 }
 0x354   : > { %1662 = vadd.xlane.f32.xlu2 %v1661_v44 }
 0x355   : > { %v1793_v9 = vpop.f32.mrf.mxu2 }
 0x357   : > { %v3149_v26 = vpop.eup %3148  ;;  %v3084_v42 = vpop.permute.xlu1 %3083 }
 0x358   : > { %v3086_v3 = vunpack.i.h.bf16 %v3084_v42  ;;  %v3085_v53 = vunpack.i.l.bf16 %v3084_v42  ;;  %v1609_v25 = vpop.xlane.xlu0 %1608  ;;  %1650 = vadd.xlane.f32.xlu0 %v1649_v49  ;;  %v4360_v23 = vmul.f32 %v3149_v26, %v1758_v34 }
 0x359   : > { %3150 = vrcp.f32 %v1609_v25 }
 0x35a   : > { %2106 = vmatpush.msra.mxu3 %v3085_v53  ;;  %2211 = vmatpush.msrb.mxu2 %v3086_v3 }
 0x35b   : > { %2829 = vmatmul.msk.f32.vlgmr.msra.gmra.mxu3 %vm1405_vm3, %v3147_v40 }
 0x35c   : > { %2245 = vmatpush.msrb.mxu3 %v3090_v28 }
 0x35d   : > { %v4397_v53 = vpop.f32.mrf.mxu2 }
 0x35e   : > { %2246 = vmatpush.msrb.mxu3 %v3091_v51 }
 0x35f   : > { %v3151_v50 = vpop.eup %3150 }
 0x360   : > { %1656 = vadd.xlane.f32.xlu0 %v1655_v11  ;;  %v4365_v22 = vmul.f32 %v3151_v50, %v1761_v57 }
 0x364   : > { %v1898_v17 = vpop.f32.mrf.mxu1 }
 0x368   : > { %1659 = vadd.xlane.f32.xlu0 %v1658_v36 }
 0x374   : > { %v1477_v59 = vpop.xlane.xlu2 %1476 }
 0x375   : > { %v1525_v29 = vsub.f32 %v4255_v30, %v1477_v59 }
 0x377   : > { %v1580_v48 = vmul.f32 1.442695, %v1525_v29 }
 0x379   : > { %3152 = vpow2.f32 %v1580_v48 }
 0x37c   : > { %v1492_v37 = vpop.xlane.xlu2 %1491 }
 0x37d   : > { %v1530_v46 = vsub.f32 %v4261_v7, %v1492_v37 }
 0x37e   : > { %v1498_v35 = vpop.xlane.xlu0 %1497 }
 0x37f   : > { %v3153_v16 = vpop.eup %3152  ;;  %v1590_v10 = vmul.f32 1.442695, %v1530_v46  ;;  %v1532_v13 = vsub.f32 %v4268_v60, %v1498_v35 }
 0x380   : > { %2830 = vmatmul.msk.f32.gmra.mxu3 %vm1405_vm3, %v3153_v16  ;;  %v1667_v63 = vsel %vm1405_vm3, %v3153_v16, 0.0 }
 0x381   : > { %3154 = vpow2.f32 %v1590_v10  ;;  %1668 = vadd.xlane.f32.xlu2 %v1667_v63  ;;  %v1594_v38 = vmul.f32 1.442695, %v1532_v13 }
 0x382   : > { %v4373_v33 = vpop.xlane.xlu1 %1599 }
 0x383   : > { %3156 = vpow2.f32 %v1594_v38 }
 0x384   : > { %v1495_v30 = vpop.xlane.xlu2 %1494 }
 0x385   : > { %v1531_v18 = vsub.f32 %v4273_v2, %v1495_v30 }
 0x386   : > { %v1501_v4 = vpop.xlane.xlu0 %1500 }
 0x387   : > { %v3155_v52 = vpop.eup %3154  ;;  %v1592_v7 = vmul.f32 1.442695, %v1531_v18  ;;  %v1533_v39 = vsub.f32 %v4282_v24, %v1501_v4 }
 0x388   : > { %2835 = vmatmul.msk.f32.vlgmr.msrb.gmra.mxu2 %vm1405_vm3, %v3155_v52  ;;  %v1682_v60 = vsel %vm1405_vm3, %v3155_v52, 0.0 }
 0x389   : > { %3158 = vpow2.f32 %v1592_v7  ;;  %1683 = vadd.xlane.f32.xlu2 %v1682_v60  ;;  %v3157_v62 = vpop.eup %3156  ;;  %v1596_v54 = vmul.f32 1.442695, %v1533_v39 }
 0x38a   : > { %v1612_v1 = vpop.xlane.xlu1 %1611  ;;  %2837 = vmatmul.msk.f32.vlgmr.msrb.gmra.mxu3 %vm1405_vm3, %v3157_v62  ;;  %v1688_v2 = vsel %vm1405_vm3, %v3157_v62, 0.0 }
 0x38b   : > { %3160 = vpow2.f32 %v1596_v54 }
 0x38c   : > { %3162 = vrcp.f32 %v1612_v1 }
 0x38f   : > { %v3159_v55 = vpop.eup %3158 }
 0x390   : > { %2836 = vmatmul.msk.f32.gmra.mxu2 %vm1405_vm3, %v3159_v55  ;;  %v1685_v24 = vsel %vm1405_vm3, %v3159_v55, 0.0 }
 0x391   : > { %1689 = vadd.xlane.f32.xlu2 %v1688_v2  ;;  %1686 = vadd.xlane.f32.xlu1 %v1685_v24  ;;  %v3161_v58 = vpop.eup %3160 }
 0x392   : > { %v3163_v15 = vpop.eup %3162  ;;  %2838 = vmatmul.msk.f32.gmra.mxu3 %vm1405_vm3, %v3161_v58  ;;  %v1636_v31 = vpop.xlane.xlu1 %1635  ;;  %v1691_v12 = vsel %vm1405_vm3, %v3161_v58, 0.0 }
 0x393   : > { %v4386_v56 = vmul.f32 %v3163_v15, %v1793_v9  ;;  %v4392_v32 = vpop.xlane.xlu2 %1671 }
 0x399   : > { %1692 = vadd.xlane.f32.xlu1 %v1691_v12 }
 0x39a   : > { %v1633_v8 = vpop.xlane.xlu1 %1632 }
 0x39b   : > { %v1624_v0 = vpop.xlane.xlu0 %1623 }
 0x39c   : > { %3164 = vrcp.f32 %v1624_v0 }
 0x39d   : > { %v1933_v59 = vpop.f32.mrf.mxu2 }
 0x3a0   : > { %v1901_v47 = vpop.f32.mrf.mxu1 }
 0x3a2   : > { %v3165_v19 = vpop.eup %3164  ;;  %v1648_v44 = vpop.xlane.xlu1 %1647 }
 0x3a3   : > { %v1630_v20 = vpop.xlane.xlu0 %1629 }
 0x3a4   : > { %v1863_v40 = vpop.f32.mrf.mxu0  ;;  %3166 = vrcp.f32 %v1630_v20 }
 0x3a5   : > { %v2294_v43 = vmul.f32 %v3165_v19, %v1863_v40  ;;  %3168 = vrcp.f32 %v1633_v8  ;;  %v1936_v38 = vpop.f32.mrf.mxu2 }
 0x3a6   : > { %3170 = vrcp.f32 %v1648_v44 }
 0x3a7   : > { %2326 = vrot.lane.b32.xlu0 %v2294_v43, %s3377_s1 }
 0x3aa   : > { %v3167_v21 = vpop.eup %3166 }
 0x3ab   : > { %v1675_v34 = vpop.xlane.xlu0 %1674  ;;  %v2296_v14 = vmul.f32 %v3167_v21, %v1898_v17  ;;  %v4395_v42 = vpop.xlane.xlu2 %1641 }
 0x3ac   : > { %v1866_v26 = vpop.f32.mrf.mxu0  ;;  %v3169_v3 = vpop.eup %3168 }
 0x3ad   : > { %2330 = vrot.lane.b32.xlu2 %v2296_v14, %s3377_s1  ;;  %v3171_v25 = vpop.eup %3170  ;;  %v2297_v28 = vmul.f32 %v3169_v3, %v1901_v47 }
 0x3af   : > { %v2038_v49 = vpop.f32.mrf.mxu1  ;;  %v4420_v14 = vpop.xlane.xlu1 %1644 }
 0x3b3   : > { %v1627_v51 = vpop.xlane.xlu0 %1626 }
 0x3b4   : > { %v2003_v50 = vpop.f32.mrf.mxu0  ;;  %3172 = vrcp.f32 %v1627_v51 }
 0x3b5   : > { %v2302_v57 = vmul.f32 %v3171_v25, %v2003_v50  ;;  %2332 = vrot.lane.b32.xlu2 %v2297_v28, %s3377_s1 }
 0x3b7   : > { %2358 = vrot.lane.b32.xlu1 %v2302_v57, %s3378_s21  ;;  %v1678_v11 = vpop.xlane.xlu2 %1677  ;;  %v2041_v36 = vpop.f32.mrf.mxu1 }
 0x3b8   : > { %3174 = vrcp.f32 %v1678_v11 }
 0x3b9   : > { %3176 = vrcp.f32 %v1636_v31 }
 0x3ba   : > { %v3173_v29 = vpop.eup %3172 }
 0x3bb   : > { %v1639_v48 = vpop.xlane.xlu0 %1638  ;;  %v2295_v37 = vmul.f32 %v3173_v29, %v1866_v26 }
 0x3bc   : > { %3178 = vrcp.f32 %v1639_v48  ;;  %v2006_v46 = vpop.f32.mrf.mxu0 }
 0x3bd   : > { %2328 = vrot.lane.b32.xlu0 %v2295_v37, %s3377_s1  ;;  %v1613_v37 = vsel %vm1405_vm3, %v4232_v41, 0.0 }
 0x3be   : > { %v3175_v16 = vpop.eup %3174 }
 0x3bf   : > { %v3177_v35 = vpop.eup %3176  ;;  %v1681_v7 = vpop.xlane.xlu2 %1680 }
 0x3c0   : > { %v2178_v10 = vpop.f32.mrf.mxu1  ;;  %v2298_v30 = vmul.f32 %v3177_v35, %v1933_v59  ;;  %v1666_v25 = vpop.xlane.xlu1 %1665 }
 0x3c1   : > { %v4402_v13 = vmul.f32 %v3175_v16, %v2178_v10 }
 0x3c2   : > { %v3179_v63 = vpop.eup %3178 }
 0x3c3   : > { %v1654_v18 = vpop.xlane.xlu0 %1653  ;;  %v4404_v52 = vmul.f32 %v3179_v63, %v1936_v38 }
 0x3c4   : > { %3180 = vrcp.f32 %v1654_v18  ;;  %v2143_v4 = vpop.f32.mrf.mxu0  ;;  %v2440_v18 = vld [vmem:[#allocation10 + $0x10] sm:$0xff] }
 0x3c5   : > { %2334 = vrot.lane.b32.xlu0 %v2298_v30, %s3377_s1  ;;  %3182 = vrcp.f32 %v1675_v34  ;;  %v4416_v34 = vpop.f32.mrf.mxu3  ;;  %v1616_v30 = vsel %vm1405_vm3, %v4196_v61, 0.0 }
 0x3c7   : > { %v2073_v54 = vpop.f32.mrf.mxu2  ;;  %v1663_v1 = vpop.xlane.xlu2 %1662 }
 0x3c8   : > { %v2181_v21 = vpop.f32.mrf.mxu1 }
 0x3ca   : > { %v3181_v39 = vpop.eup %3180 }
 0x3cb   : > { %v1651_v60 = vpop.xlane.xlu0 %1650  ;;  %v2304_v62 = vmul.f32 %v3181_v39, %v2038_v49  ;;  %v3183_v2 = vpop.eup %3182 }
 0x3cc   : > { %3184 = vrcp.f32 %v1651_v60  ;;  %v2146_v55 = vpop.f32.mrf.mxu0 }
 0x3cd   : > { %2362 = vrot.lane.b32.xlu1 %v2304_v62, %s3378_s21  ;;  %3186 = vrcp.f32 %v1663_v1  ;;  %v2311_v58 = vmul.f32 %v3183_v2, %v2146_v55  ;;  %v4422_v49 = vpop.f32.mrf.mxu3 }
 0x3cf   : > { %v2076_v12 = vpop.f32.mrf.mxu2 }
 0x3d2   : > { %v3185_v24 = vpop.eup %3184 }
 0x3d3   : > { %v1657_v15 = vpop.xlane.xlu0 %1656  ;;  %v2303_v9 = vmul.f32 %v3185_v24, %v2006_v46  ;;  %v3187_v31 = vpop.eup %3186 }
 0x3d4   : > { %3188 = vrcp.f32 %v1657_v15  ;;  %v2307_v17 = vmul.f32 %v3187_v31, %v2076_v12 }
 0x3d5   : > { %2360 = vrot.lane.b32.xlu2 %v2303_v9, %s3378_s21  ;;  %2392 = vrot.lane.b32.xlu1 %v2311_v58, %s3379_s5  ;;  %3190 = vrcp.f32 %v4392_v32  ;;  %v1968_v28 = vpop.f32.mrf.mxu3 }
 0x3da   : > { %v3189_v0 = vpop.eup %3188 }
 0x3db   : > { %v1660_v8 = vpop.xlane.xlu0 %1659  ;;  %v2305_v19 = vmul.f32 %v3189_v0, %v2041_v36  ;;  %v3191_v20 = vpop.eup %3190  ;;  %v1619_v0 = vsel %vm1405_vm3, %v4234_v27, 0.0 }
 0x3dc   : > { %3192 = vrcp.f32 %v1660_v8  ;;  %v2310_v43 = vmul.f32 %v3191_v20, %v2143_v4  ;;  %v2438_v4 = vld [vmem:[#allocation10] sm:$0xff] }
 0x3dd   : > { %2368 = vrot.lane.b32.xlu1 %v2307_v17, %s3378_s21  ;;  %2364 = vrot.lane.b32.xlu2 %v2305_v19, %s3378_s21  ;;  %3194 = vrcp.f32 %v1681_v7  ;;  %v4424_v29 = vpop.f32.mrf.mxu3  ;;  %v2439_v7 = vld [vmem:[#allocation10 + $0x8] sm:$0xff] }
 0x3e2   : > { %v3193_v40 = vpop.eup %3192 }
 0x3e3   : > { %v2306_v47 = vmul.f32 %v3193_v40, %v2073_v54  ;;  %v3195_v44 = vpop.eup %3194 }
 0x3e4   : > { %v2313_v32 = vmul.f32 %v3195_v44, %v2181_v21 }
 0x3e5   : > { %2366 = vrot.lane.b32.xlu0 %v2306_v47, %s3378_s21  ;;  %2390 = vrot.lane.b32.xlu2 %v2310_v43, %s3379_s5  ;;  %v2108_v63 = vpop.f32.mrf.mxu3 }
 0x3ed   : > { %2396 = vrot.lane.b32.xlu0 %v2313_v32, %s3379_s5 }
 0x3f4   : > { %v4418_v26 = vpop.xlane.xlu2 %1668 }
 0x3fc   : > { %v1684_v3 = vpop.xlane.xlu2 %1683 }
 0x3fd   : > { %3196 = vrcp.f32 %v1684_v3 }
 0x403   : > { %v3197_v57 = vpop.eup %3196  ;;  %v2111_v41 = vpop.f32.mrf.mxu3 }
 0x404   : > { %v1690_v51 = vpop.xlane.xlu2 %1689  ;;  %v1687_v50 = vpop.xlane.xlu1 %1686 }
 0x405   : > { %3198 = vrcp.f32 %v1687_v50 }
 0x406   : > { %3200 = vrcp.f32 %v1666_v25 }
 0x40b   : > { %v2213_v11 = vpop.f32.mrf.mxu2  ;;  %v3199_v46 = vpop.eup %3198 }
 0x40c   : > { %v2314_v36 = vmul.f32 %v3197_v57, %v2213_v11  ;;  %v2331_v59 = vpop.permute.xlu2 %2330  ;;  %v3201_v60 = vpop.eup %3200 }
 0x40d   : > { %v2416_v48 = vsel %vm742_vm2, %v4360_v23, %v2331_v59  ;;  %v2441_v23 = vld [vmem:[#allocation10 + $0x18] sm:$0xff]  ;;  %v2248_v39 = vpop.f32.mrf.mxu3  ;;  %v2308_v62 = vmul.f32 %v3201_v60, %v2108_v63 }
 0x40e   : > { %2398 = vrot.lane.b32.xlu1 %v2314_v36, %s3379_s5  ;;  %1614 = vadd.xlane.f32.xlu2 %v1613_v37 }
 0x40f   : > { %2482 = vmatpush.msra.mxu0 %v2441_v23 }
 0x411   : > { %2483 = vmatpush.msra.mxu0 %v2440_v18 }
 0x413   : > { %v2216_v16 = vpop.f32.mrf.mxu2  ;;  %2484 = vmatpush.msra.mxu0 %v2439_v7 }
 0x414   : > { %v2315_v10 = vmul.f32 %v3199_v46, %v2216_v16  ;;  %v2333_v35 = vpop.permute.xlu2 %2332 }
 0x415   : > { %v2417_v38 = vsel %vm742_vm2, %v4365_v22, %v2333_v35  ;;  %2485 = vmatpush.msra.mxu0 %v2438_v4  ;;  %v1693_v22 = vpop.xlane.xlu1 %1692  ;;  %v2251_v61 = vpop.f32.mrf.mxu3 }
 0x416   : > { %2400 = vrot.lane.b32.xlu1 %v2315_v10, %s3379_s5  ;;  %3202 = vrcp.f32 %v1693_v22 }
 0x417   : > { %1617 = vadd.xlane.f32.xlu0 %v1616_v30  ;;  %3204 = vrcp.f32 %v4395_v42 }
 0x418   : > { %3206 = vrcp.f32 %v4373_v33 }
 0x419   : > { %3208 = vrcp.f32 %v1690_v51 }
 0x41a   : > { %3210 = vrcp.f32 %v4349_v45 }
 0x41b   : > { %3212 = vrcp.f32 %v4420_v14 }
 0x41c   : > { %v3203_v1 = vpop.eup %3202  ;;  %3214 = vrcp.f32 %v4418_v26 }
 0x41d   : > { %v2317_v55 = vmul.f32 %v3203_v1, %v2251_v61  ;;  %v3205_v2 = vpop.eup %3204 }
 0x41e   : > { %v3207_v15 = vpop.eup %3206 }
 0x41f   : > { %v3209_v9 = vpop.eup %3208  ;;  %v2286_v12 = vmul.f32 %v3207_v15, %v4384_v6 }
 0x420   : > { %v2316_v31 = vmul.f32 %v3209_v9, %v2248_v39  ;;  %v3211_v17 = vpop.eup %3210 }
 0x421   : > { %v2287_v43 = vmul.f32 %v3211_v17, %v4389_v5  ;;  %v3213_v47 = vpop.eup %3212 }
 0x422   : > { %v2301_v21 = vmul.f32 %v3213_v47, %v4424_v29  ;;  %v3215_v3 = vpop.eup %3214 }
 0x423   : > { %v2309_v25 = vmul.f32 %v3215_v3, %v2111_v41 }
 0x426   : > { %2394 = vrot.lane.b32.xlu2 %v4402_v13, %s3379_s5  ;;  %v2300_v13 = vmul.f32 %v3205_v2, %v1968_v28 }
 0x429   : > { %v2359_v24 = vpop.permute.xlu1 %2358 }
 0x42b   : > { %2370 = vrot.lane.b32.xlu0 %v2308_v62, %s3378_s21 }
 0x42e   : > { %2336 = vrot.lane.b32.xlu2 %v4404_v52, %s3377_s1  ;;  %v2327_v52 = vpop.permute.xlu0 %2326 }
 0x42f   : > { %v2361_v54 = vpop.permute.xlu2 %2360  ;;  %v2414_v33 = vsel %vm742_vm2, %v2286_v12, %v2327_v52 }
 0x430   : > { %v2422_v8 = vsel %vm1405_vm3, %v2414_v33, %v2359_v24 }
 0x433   : > { %2404 = vrot.lane.b32.xlu0 %v2317_v55, %s3379_s5 }
 0x436   : > { %2338 = vrot.lane.b32.xlu2 %v2300_v13, %s3377_s1  ;;  %v2329_v6 = vpop.permute.xlu0 %2328 }
 0x437   : > { %v2365_v58 = vpop.permute.xlu2 %2364  ;;  %v2415_v27 = vsel %vm742_vm2, %v2287_v43, %v2329_v6 }
 0x438   : > { %v2425_v42 = vsel %vm1405_vm3, %v2417_v38, %v2365_v58  ;;  %v2423_v44 = vsel %vm1405_vm3, %v2415_v27, %v2361_v54 }
 0x43e   : > { %2402 = vrot.lane.b32.xlu2 %v2316_v31, %s3379_s5  ;;  %v2335_v5 = vpop.permute.xlu0 %2334 }
 0x43f   : > { %v2363_v19 = vpop.permute.xlu1 %2362  ;;  %v2391_v20 = vpop.permute.xlu2 %2390  ;;  %v2418_v37 = vsel %vm742_vm2, %v4386_v56, %v2335_v5 }
 0x440   : > { %1620 = vadd.xlane.f32.xlu1 %v1619_v0  ;;  %v2424_v45 = vsel %vm1405_vm3, %v2416_v48, %v2363_v19  ;;  %v2430_v40 = vsel %vm588_vm1, %v2422_v8, %v2391_v20 }
 0x441   : > { %2839 = vmatmul.msk.f32.vlgmr.msra.gmra.mxu0 %vm522_vm0, %v2430_v40 }
 0x446   : > { %2340 = vrot.lane.b32.xlu2 %v2301_v21, %s3377_s1 }
 0x447   : > { %v2393_v32 = vpop.permute.xlu1 %2392 }
 0x448   : > { %v2431_v14 = vsel %vm588_vm1, %v2423_v44, %v2393_v32 }
 0x449   : > { %2840 = vmatmul.msk.f32.gmra.mxu0 %vm522_vm0, %v2431_v14 }
 0x44e   : > { %2372 = vrot.lane.b32.xlu2 %v2309_v25, %s3378_s21 }
 0x44f   : > { %v2369_v26 = vpop.permute.xlu1 %2368 }
 0x457   : > { %v2367_v51 = vpop.permute.xlu0 %2366 }
 0x458   : > { %v2426_v46 = vsel %vm1405_vm3, %v2418_v37, %v2367_v51 }
 0x45f   : > { %v2397_v11 = vpop.permute.xlu0 %2396 }
 0x460   : > { %v2433_v36 = vsel %vm588_vm1, %v2425_v42, %v2397_v11 }
 0x480   : > { %v2399_v48 = vpop.permute.xlu1 %2398 }
 0x481   : > { %v1615_v28 = vpop.xlane.xlu2 %1614  ;;  %v2434_v35 = vsel %vm588_vm1, %v2426_v46, %v2399_v48 }
 0x482   : > { %3216 = vrcp.f32 %v1615_v28 }
 0x488   : > { %v3217_v29 = vpop.eup %3216  ;;  %v2401_v23 = vpop.permute.xlu1 %2400 }
 0x489   : > { %v2395_v50 = vpop.permute.xlu2 %2394  ;;  %v2291_v10 = vmul.f32 %v3217_v29, %v4397_v53 }
 0x48a   : > { %v2432_v57 = vsel %vm588_vm1, %v2424_v45, %v2395_v50  ;;  %v1618_v16 = vpop.xlane.xlu0 %1617 }
 0x48b   : > { %2841 = vmatmul.msk.f32.gmra.mxu0 %vm522_vm0, %v2432_v57  ;;  %3218 = vrcp.f32 %v1618_v16 }
 0x491   : > { %v2337_v59 = vpop.permute.xlu2 %2336  ;;  %v3219_v7 = vpop.eup %3218 }
 0x492   : > { %v2419_v63 = vsel %vm742_vm2, %v2291_v10, %v2337_v59  ;;  %v2292_v56 = vmul.f32 %v3219_v7, %v4416_v34  ;;  %v3093_v34 = vld [vmem:[%s4549_s6] ss:$0 sm:$0xff] }
 0x493   : > { %2842 = vmatmul.msk.f32.gmra.mxu0 %vm522_vm0, %v2433_v36  ;;  %v2427_v30 = vsel %vm1405_vm3, %v2419_v63, %v2369_v26 }
 0x494   : > { %v2435_v18 = vsel %vm588_vm1, %v2427_v30, %v2401_v23 }
 0x499   : > { %v2339_v38 = vpop.permute.xlu2 %2338 }
 0x49a   : > { %v2420_v4 = vsel %vm742_vm2, %v2292_v56, %v2339_v38 }
 0x49b   : > { %2843 = vmatmul.msk.f32.gmra.mxu0 %vm522_vm0, %v2434_v35 }
 0x49d   : > { %v2371_v41 = vpop.permute.xlu0 %2370 }
 0x49e   : > { %v2428_v39 = vsel %vm1405_vm3, %v2420_v4, %v2371_v41 }
 0x4a1   : > { %v2403_v53 = vpop.permute.xlu2 %2402 }
 0x4a2   : > { %v2436_v22 = vsel %vm588_vm1, %v2428_v39, %v2403_v53 }
 0x4a3   : > { %2844 = vmatmul.msk.f32.gmra.mxu0 %vm522_vm0, %v2435_v18 }
 0x4a5   : > { %v2405_v2 = vpop.permute.xlu0 %2404 }
 0x4a9   : > { %v2341_v60 = vpop.permute.xlu2 %2340 }
 0x4ab   : > { %2845 = vmatmul.msk.f32.gmra.mxu0 %vm522_vm0, %v2436_v22 }
 0x4b1   : > { %v2373_v1 = vpop.permute.xlu2 %2372 }
 0x4b3   : > { %v1621_v62 = vpop.xlane.xlu1 %1620 }
 0x4b4   : > { %3220 = vrcp.f32 %v1621_v62 }
 0x4ba   : > { %v3221_v61 = vpop.eup %3220 }
 0x4bb   : > { %v2293_v54 = vmul.f32 %v3221_v61, %v4422_v49 }
 0x4bd   : > { %v2421_v55 = vsel %vm742_vm2, %v2293_v54, %v2341_v60 }
 0x4be   : > { %v2429_v13 = vsel %vm1405_vm3, %v2421_v55, %v2373_v1  ;;  %v2487_v24 = vpop.f32.mrf.mxu0 }
 0x4bf   : > { %v2437_v58 = vsel %vm588_vm1, %v2429_v13, %v2405_v2  ;;  %v2488_v42 = vadd.f32 %v3093_v34, %v2487_v24 }
 0x4c0   : > { %2846 = vmatmul.msk.f32.gmra.mxu0 %vm522_vm0, %v2437_v58 }
 0x4c1   : > { %2511 = vst.msk [vmem:[%s503_s22] sm:$0xff] %vm522_vm0, %v2488_v42 }
 0x4c6   : > { %v2490_v49 = vpop.f32.mrf.mxu0 }
 0x4c7   : > { %v2491_v15 = vadd.f32 %v3093_v34, %v2490_v49 }
 0x4c9   : > { %2512 = vst.msk [vmem:[%s503_s22 + $0x8] sm:$0xff] %vm522_vm0, %v2491_v15 }
 0x508   : > { %v2493_v52 = vpop.f32.mrf.mxu0 }
 0x509   : > { %v2494_v9 = vadd.f32 %v3093_v34, %v2493_v52 }
 0x50b   : > { %2513 = vst.msk [vmem:[%s503_s22 + $0x10] sm:$0xff] %vm522_vm0, %v2494_v9 }
 0x510   : > { %v2496_v31 = vpop.f32.mrf.mxu0 }
 0x511   : > { %v2497_v12 = vadd.f32 %v3093_v34, %v2496_v31 }
 0x513   : > { %2514 = vst.msk [vmem:[%s503_s22 + $0x18] sm:$0xff] %vm522_vm0, %v2497_v12 }
 0x518   : > { %v2499_v33 = vpop.f32.mrf.mxu0 }
 0x519   : > { %v2500_v0 = vadd.f32 %v3093_v34, %v2499_v33 }
 0x51b   : > { %2515 = vst.msk [vmem:[%s503_s22 + $0x20] sm:$0xff] %vm522_vm0, %v2500_v0 }
 0x520   : > { %v2502_v17 = vpop.f32.mrf.mxu0 }
 0x521   : > { %v2503_v8 = vadd.f32 %v3093_v34, %v2502_v17 }
 0x523   : > { %2516 = vst.msk [vmem:[%s503_s22 + $0x28] sm:$0xff] %vm522_vm0, %v2503_v8 }
 0x528   : > { %v2505_v19 = vpop.f32.mrf.mxu0 }
 0x529   : > { %v2506_v20 = vadd.f32 %v3093_v34, %v2505_v19 }
 0x52b   : > { %2517 = vst.msk [vmem:[%s503_s22 + $0x30] sm:$0xff] %vm522_vm0, %v2506_v20 }
 0x53d   : > { %v2508_v45 = vpop.f32.mrf.mxu0 }
 0x53e   : > { %v2509_v40 = vadd.f32 %v3093_v34, %v2508_v45 }
 0x540   : > { %2518 = vst.msk [vmem:[%s503_s22 + $0x38] sm:$0xff] %vm522_vm0, %v2509_v40 }
 0x541   : > { %s2855_s23 = sshll.u32 %s3340_s27, 4  ;;  %s2545_s11 = sshll.u32 %s503_s22, 4  ;;  %s2546_s11 = int_to_ptr.vmem [resolvable:$true] %s2545_s11 }
 0x542   : > { %s2534_s30 = scalar_lea.hbm %s4550_s7, %s2855_s23  ;;  %s3380_s17 = smov 256  }
 0x543   : > { %s2547_s13 = sshll.u32 %s2534_s30, 4  ;;  %2903 = sst [smem:[#allocation19]] (%p3484_p9), %s3380_s17  ;;  %s2548_s13 = int_to_ptr.hbm [resolvable:$true] %s2547_s13 }
 0x544   : > { %s3381_s10 = smov 1024   ;;  %s3382_s0 = smov 2  }
 0x545   : > { %2904 = sst [smem:[#allocation19 + $0x1]] (%p3484_p9), %s3381_s10  ;;  %s3383_s27 = smov 128  }
 0x546   : > { %2905 = sst [smem:[#allocation19 + $0x2]] (%p3484_p9), %s3382_s0  ;;  %s3384_s28 = smov 8  }
 0x547   : > { %2906 = sst [smem:[#allocation19 + $0x3]] (%p3484_p9), %s3383_s27  ;;  %s3385_s9 = smov [#allocation18]  }
 0x548   : > { %2907 = sst [smem:[#allocation19 + $0x4]] (%p3484_p9), %s3383_s27  ;;  %s3386_s19 = smov 0  }
 0x549   : > { %2908 = sst [smem:[#allocation19 + $0x5]] (%p3484_p9), %s3384_s28 }
 0x54a   : > { %2909 = dma.general (%p3484_p9), %s2546_s11, 1024, %s2548_s13, %s2520_s8, %s3385_s9, [#allocation19], %s3386_s19, 0  }
 0x54b PF: > { %p2926_p4 = scmp.ge.s32.totalorder %s3348_s29, 2  ;;  %s2575_s1 = sand.u32 1, %s3328_s24  }
 0x54c   : > { %s2576_s21 = scalar_lea.sflag [#allocation5], %s2575_s1 }
 0x54d   : > { %p2919_p5 = pnand %p2926_p4, %p3491_p11 }
 0x54f   : > { %p2920_p6 = pneg %p2919_p5 }
 0x551   : > { %3323 = dma.done.wait (%p2920_p6), %s2576_s21, 1024  }
 0x552   : > { %3325 = vsyncadd (%p2920_p6), %s2576_s21, 4294966272  ;;  %s24_s29 = sadd.s32 1, %s3348_s29   ;;  %s4569_s5 = sld [smem:[#allocation30_spill]] }
 0x553   : > { %p21_p7 = scmp.ge.s32.totalorder %s24_s29, 6   ;;  %s4570_s27 = sld [smem:[#allocation28_spill]] }
 0x554   : > { %s4571_s28 = sld [smem:[#allocation29_spill]]  ;;  %s4572_s24 = smov %s3332_s25 }
 0x555   : > { %s4573_s25 = smov %s3336_s26  ;;  %23 = sbr.rel (!%p21_p7) target bundleno = 11 (0xb), region = 146 }
 0x558   : > { %s4574_s26 = smov %s4569_s5 }
 0x55a   :  { %2582 = vsyncpa [#allocation4], 1 }
 0x55b   :  { %2584 = vsyncpa [#allocation4 + $0x1], 1 }
 0x55c   :  { %2585 = vsyncpa [#allocation7], 1 }
 0x55d   :  { %2586 = vsyncpa [#allocation5], 1 }
 0x55e   :  { %2588 = vsyncpa [#allocation5 + $0x1], 1 }

</bundles_post_ra>
